<compile_context>
chip_gen: v6e
topology: v6e:2x2x1
jax: 0.10.0
libtpu: 0.0.40
codegen_flags: <defaults>
</compile_context>

<pallas_src>
import jax
import jax.numpy as jnp
from jax.experimental import pallas as pl
from jax.experimental.pallas import tpu as pltpu


def mlp_kernel(x_ref, w1_ref, b1_ref, w2_ref, o_ref):
    # x_ref: (TB, D) f32 | w1_ref: (D, I) bf16 | b1_ref: (1, I) f32
    # w2_ref: (I, D) bf16 | o_ref: (TB, D) f32 (or bf16)
    x = x_ref[...].astype(jnp.bfloat16)                 # in-kernel cast (VPU, hidden under MXU)
    h = jnp.dot(x, w1_ref[...], preferred_element_type=jnp.float32)
    h = jnp.maximum(h + b1_ref[...], 0.0)               # bias + ReLU in f32
    y = jnp.dot(h.astype(jnp.bfloat16), w2_ref[...],    # bf16 MXU, f32 acc
                preferred_element_type=jnp.float32)
    o_ref[...] = y.astype(o_ref.dtype)


def prepare_params(w1, b1, w2):
    """One-time parameter prep (transpose + cast) so forward is transpose-free.

    w1: (I, D), b1: (I,), w2: (D, I)  -- PyTorch nn.Linear layout.
    Returns w1_t: (D, I) bf16, b1_2d: (1, I) f32, w2_t: (I, D) bf16.
    """
    w1_t = jnp.asarray(w1, jnp.float32).T.astype(jnp.bfloat16)
    w2_t = jnp.asarray(w2, jnp.float32).T.astype(jnp.bfloat16)
    b1_2d = jnp.asarray(b1, jnp.float32).reshape(1, -1)
    return w1_t, b1_2d, w2_t


def _choose_tb(B, tb_max=512):
    """Pick a batch tile that divides B exactly (no pad pass), satisfies the
    (8, 128) sublane rule, and — for v7x megacore — gives an even tile count
    >= 2 when possible so both TensorCores do work."""
    if B <= 8 or B % 8 != 0:
        return B                          # single full-extent tile (always legal)
    best_even = None
    best_any = None
    for t in range(min(tb_max, B), 7, -8):
        if B % t:
            continue
        n = B // t
        if best_any is None:
            best_any = t                  # largest divisor tile (possibly 1 or odd tiles)
        if n >= 2 and n % 2 == 0:
            best_even = t                 # largest tile with an even #tiles
            break
    return best_even or best_any or B


def mlp_forward(x, w1_t, b1_2d, w2_t, *, tb_max=512, out_dtype=jnp.float32):
    """x: (B, D) f32. Weights must come from prepare_params()."""
    B, D = x.shape
    I = w1_t.shape[1]

    tb = _choose_tb(B, tb_max)
    num_tiles = B // tb                   # tb always divides B (or equals it)

    # VMEM budget: single-buffered resident weights + pipelined x/out tiles
    # + bias + f32 intermediate h, with ~30% headroom; clamped to physical VMEM.
    bf16, f32 = 2, 4
    out_bytes = jnp.dtype(out_dtype).itemsize
    footprint = (
        (D * I + I * D) * bf16            # W1 + W2 resident, Buffered(1)
        + I * f32                         # b1 resident, Buffered(1)
        + 2 * tb * D * f32                # x tiles (double-buffered, f32 in)
        + 2 * tb * D * out_bytes          # out tiles (double-buffered)
        + 2 * tb * I * f32                # h + temporaries
    )
    try:
        vmem_cap = pltpu.get_tpu_info().vmem_capacity_bytes
    except Exception:
        vmem_cap = 64 << 20               # conservative: v7x per-TC VMEM
    vmem_limit = max(16 << 20,
                     min(int(footprint * 1.3) + (4 << 20), vmem_cap - (4 << 20)))

    out = pl.pallas_call(
        mlp_kernel,
        out_shape=jax.ShapeDtypeStruct((B, D), out_dtype),
        grid_spec=pltpu.PrefetchScalarGridSpec(
            num_scalar_prefetch=0,
            grid=(num_tiles,),
            in_specs=[
                pl.BlockSpec((tb, D), lambda i: (i, 0)),            # x: streamed per tile
                pl.BlockSpec((D, I), lambda i: (0, 0),
                             pipeline_mode=pl.Buffered(1)),         # W1: resident, 1 buffer
                pl.BlockSpec((1, I), lambda i: (0, 0),
                             pipeline_mode=pl.Buffered(1)),         # b1: resident, 1 buffer
                pl.BlockSpec((I, D), lambda i: (0, 0),
                             pipeline_mode=pl.Buffered(1)),         # W2: resident, 1 buffer
            ],
            out_specs=pl.BlockSpec((tb, D), lambda i: (i, 0)),
        ),
        compiler_params=pltpu.CompilerParams(
            dimension_semantics=("parallel",),                      # megacore sharding (v7x)
            vmem_limit_bytes=vmem_limit,
        ),
    )(x, w1_t, b1_2d, w2_t)

    return out


def init_params(key, dim):
    """Deterministic init mirroring PyTorch nn.Linear default (+/- 1/sqrt(fan_in))."""
    intermediate = dim * 2
    k1, k2, k3 = jax.random.split(key, 3)
    bound1 = 1.0 / jnp.sqrt(dim)
    w1 = jax.random.uniform(k1, (intermediate, dim), jnp.float32, -bound1, bound1)
    b1 = jax.random.uniform(k2, (intermediate,), jnp.float32, -bound1, bound1)
    bound2 = 1.0 / jnp.sqrt(intermediate)
    w2 = jax.random.uniform(k3, (dim, intermediate), jnp.float32, -bound2, bound2)
    return w1, b1, w2


if __name__ == "__main__":
    # Small shapes consistent with the module: MLP(dim) -> intermediate = 2*dim.
    # B=512, DIM=256: _choose_tb picks tb=256 -> 2 grid steps (even, megacore-friendly).
    B, DIM = 512, 256
    key = jax.random.PRNGKey(0)
    kx, kp = jax.random.split(key)
    x = jax.random.normal(kx, (B, DIM), jnp.float32)
    w1, b1, w2 = init_params(kp, DIM)

    # One-time parameter prep (hoisted out of the forward path).
    w1_t, b1_2d, w2_t = prepare_params(w1, b1, w2)

    fwd = jax.jit(mlp_forward)
    y = jax.block_until_ready(fwd(x, w1_t, b1_2d, w2_t))
    assert y.shape == (B, DIM)
    assert y.dtype == jnp.float32

    # bf16-faithful reference (same casts as the kernel, f32 accumulation).
    x_bf = x.astype(jnp.bfloat16).astype(jnp.float32)
    h_ref = jnp.maximum(x_bf @ w1_t.astype(jnp.float32) + b1_2d, 0.0)
    ref = h_ref.astype(jnp.bfloat16).astype(jnp.float32) @ w2_t.astype(jnp.float32)
    assert jnp.allclose(y, ref, atol=1e-2, rtol=1e-2), float(jnp.max(jnp.abs(y - ref)))

    # Sanity check vs. the pure-f32 PyTorch-equivalent math (loose: bf16 matmuls).
    ref_f32 = jnp.maximum(x @ w1.T + b1, 0.0) @ w2.T
    assert jnp.allclose(y, ref_f32, atol=1e-1, rtol=1e-1)

    print("KERNEL_OK")
</pallas_src>

<mosaic_0001>
module attributes {stable_mosaic.version = 11 : i64} {
  func.func @mlp_kernel(%arg0: i32, %arg1: memref<256x256xf32, #tpu.memory_space<vmem>>, %arg2: memref<256x512xbf16, #tpu.memory_space<vmem>>, %arg3: memref<1x512xf32, #tpu.memory_space<vmem>>, %arg4: memref<512x256xbf16, #tpu.memory_space<vmem>>, %arg5: memref<256x256xf32, #tpu.memory_space<vmem>>) attributes {dimension_semantics = [#tpu.dimension_semantics<parallel>], iteration_bounds = array<i64: 2>, scalar_prefetch = 0 : i64, scratch_operands = 0 : i64, tpu.core_type = #tpu.core_type<tc>, window_params = [{transform_indices = @transform_0, window_bounds = array<i64: 256, 256>}, {pipeline_mode = #tpu.pipeline_mode<synchronous>, transform_indices = @transform_1, window_bounds = array<i64: 256, 512>}, {pipeline_mode = #tpu.pipeline_mode<synchronous>, transform_indices = @transform_2, window_bounds = array<i64: 1, 512>}, {pipeline_mode = #tpu.pipeline_mode<synchronous>, transform_indices = @transform_3, window_bounds = array<i64: 512, 256>}, {transform_indices = @transform_4, window_bounds = array<i64: 256, 256>}]} {
    %c0 = arith.constant 0 : index
    %c0_0 = arith.constant 0 : index
    %0 = vector.load %arg1[%c0, %c0_0] : memref<256x256xf32, #tpu.memory_space<vmem>>, vector<256x256xf32>
    %1 = arith.truncf %0 : vector<256x256xf32> to vector<256x256xbf16>
    %c0_1 = arith.constant 0 : index
    %c0_2 = arith.constant 0 : index
    %2 = vector.load %arg2[%c0_1, %c0_2] : memref<256x512xbf16, #tpu.memory_space<vmem>>, vector<256x512xbf16>
    %cst = arith.constant dense<0.000000e+00> : vector<256x512xf32>
    %3 = tpu.matmul %1, %2, %cst {dimension_numbers = #tpu.dot_dimension_numbers<[1], [0], [0], [1], [0, 0, 1, 1], [], []>} : vector<256x256xbf16>, vector<256x512xbf16>, vector<256x512xf32> -> vector<256x512xf32>
    %c0_3 = arith.constant 0 : index
    %c0_4 = arith.constant 0 : index
    %4 = vector.load %arg3[%c0_3, %c0_4] : memref<1x512xf32, #tpu.memory_space<vmem>>, vector<1x512xf32>
    %5 = vector.broadcast %4 : vector<1x512xf32> to vector<256x512xf32>
    %6 = arith.addf %3, %5 : vector<256x512xf32>
    %cst_5 = arith.constant 0.000000e+00 : f32
    %7 = vector.broadcast %cst_5 : f32 to vector<256x512xf32>
    %8 = arith.maximumf %6, %7 : vector<256x512xf32>
    %9 = arith.truncf %8 : vector<256x512xf32> to vector<256x512xbf16>
    %c0_6 = arith.constant 0 : index
    %c0_7 = arith.constant 0 : index
    %10 = vector.load %arg4[%c0_6, %c0_7] : memref<512x256xbf16, #tpu.memory_space<vmem>>, vector<512x256xbf16>
    %cst_8 = arith.constant dense<0.000000e+00> : vector<256x256xf32>
    %11 = tpu.matmul %9, %10, %cst_8 {dimension_numbers = #tpu.dot_dimension_numbers<[1], [0], [0], [1], [0, 0, 1, 1], [], []>} : vector<256x512xbf16>, vector<512x256xbf16>, vector<256x256xf32> -> vector<256x256xf32>
    %c0_9 = arith.constant 0 : index
    %c0_10 = arith.constant 0 : index
    %12 = vector.load %arg5[%c0_9, %c0_10] : memref<256x256xf32, #tpu.memory_space<vmem>>, vector<256x256xf32>
    tpu.vector_store %arg5[%c0_9, %c0_10], %11 {strides = array<i32>} : memref<256x256xf32, #tpu.memory_space<vmem>>, vector<256x256xf32>,
    return
  }
  func.func @transform_0(%arg0: i32) -> (i32, i32) {
    %c0_i32 = arith.constant 0 : i32
    %c0_i32_0 = arith.constant 0 : i32
    return %arg0, %c0_i32 : i32, i32
  }
  func.func @transform_1(%arg0: i32) -> (i32, i32) {
    %c0_i32 = arith.constant 0 : i32
    %c0_i32_0 = arith.constant 0 : i32
    %c0_i32_1 = arith.constant 0 : i32
    return %c0_i32, %c0_i32_0 : i32, i32
  }
  func.func @transform_2(%arg0: i32) -> (i32, i32) {
    %c0_i32 = arith.constant 0 : i32
    %c0_i32_0 = arith.constant 0 : i32
    %c0_i32_1 = arith.constant 0 : i32
    return %c0_i32, %c0_i32_0 : i32, i32
  }
  func.func @transform_3(%arg0: i32) -> (i32, i32) {
    %c0_i32 = arith.constant 0 : i32
    %c0_i32_0 = arith.constant 0 : i32
    %c0_i32_1 = arith.constant 0 : i32
    return %c0_i32, %c0_i32_0 : i32, i32
  }
  func.func @transform_4(%arg0: i32) -> (i32, i32) {
    %c0_i32 = arith.constant 0 : i32
    %c0_i32_0 = arith.constant 0 : i32
    return %arg0, %c0_i32 : i32, i32
  }
}

</mosaic_0001>

<bundles_post_ra>
// kernel: mlp_forward.1
= control target key start
LH: loop header
LB: loop body
LE: loop exit
PB: predicated region body
PF: predicated region fallthrough
CT: control target
= control target key end

     0   :  { %9 = vsyncpa [#allocation3], 0  ;;  %s3416_s0 = inlined_call_operand.hbm [shape: f32[512,256], index: 0, kind: input, shape index: {}]   ;;  %s3417_s1 = inlined_call_operand.hbm [shape: bf16[256,512], index: 1, kind: input, shape index: {}]   ;;  %s3418_s2 = inlined_call_operand.hbm [shape: f32[1,512], index: 2, kind: input, shape index: {}]   ;;  %s3419_s3 = inlined_call_operand.hbm [shape: bf16[512,256], index: 3, kind: input, shape index: {}]   ;;  %s3420_s4 = inlined_call_operand.hbm [shape: f32[512,256], index: 4, kind: output, shape index: {}]  }
   0x1   :  { %11 = vsyncpa [#allocation3 + $0x1], 0 }
   0x2   :  { %12 = vsyncpa [#allocation6], 0 }
   0x3   :  { %13 = vsyncpa [#allocation9], 0 }
   0x4   :  { %14 = vsyncpa [#allocation4], 0 }
   0x5   :  { %16 = vsyncpa [#allocation4 + $0x1], 0  ;;  %s2937_s15 = smov 0   ;;  %s2939_s16 = smov 0  }
   0x6   :  { %s2941_s17 = smov 0   ;;  %s2943_s18 = smov 0  }
   0x7 LB: > { %s2958_s19 = sadd.s32 4294967295, %s2899_s18   ;;  %s2292_s20 = sadd.s32 4294967294, %s2899_s18   ;;  %s2899_s18 = sphi %s2943_s18, %s3444_s18   ;;  %s2895_s17 = sphi %s2941_s17, %s3443_s17   ;;  %s2891_s16 = sphi %s2939_s16, %s3442_s16   ;;  %s2887_s15 = sphi %s2937_s15, %s3441_s15  }
   0x8   : > { %p42_p0 = scmp.ne.s32.totalorder %s2891_s16, %s2887_s15  ;;  %p3421_p1 = scmp.eq.s32.totalorder %s2958_s19, 0 }
   0x9   : > { %p135_p3 = scmp.eq.s32.totalorder %s2292_s20, 1  ;;  %p2293_p5 = scmp.ge.s32.totalorder %s2899_s18, 1 }
   0xa   : > { %p2967_p4 = por %p3421_p1, %p42_p0  ;;  %p142_p7 = scmp.lt.s32.totalorder %s2899_s18, 3 }
   0xb   : > { %p2972_p6 = por %p135_p3, %p42_p0  ;;  %s2901_s24 = smov [#allocation5]  }
   0xc   : > { %s3425_s21 = scalar_select %p2967_p4, 1, 0 }
   0xd   : > { %s3426_s22 = scalar_select %p2972_p6, 1, 0 }
   0xe   : > { %p2977_p8 = pnand %p2293_p5, %p142_p7  ;;  %s154_s25 = sshll.u32 %s2901_s24, 4  ;;  %s155_s25 = int_to_ptr.vmem [resolvable:$true] %s154_s25 }
   0xf   : > { %s2902_s27 = smov [#allocation7]   ;;  %s2903_s29 = smov [#allocation8]  }
  0x10   : > { %s3427_s23 = scalar_select %p2977_p8, 1, 0 }
  0x11   : > { %p2462_p9 = pneg %p2977_p8  ;;  %s168_s28 = sshll.u32 %s2902_s27, 4  ;;  %s169_s28 = int_to_ptr.vmem [resolvable:$true] %s168_s28 }
  0x12   : > { %s178_s30 = sshll.u32 %s2903_s29, 4  ;;  %s2732_s5 = scalar_lea.vmem %s155_s25, 8192  ;;  %s179_s30 = int_to_ptr.vmem [resolvable:$true] %s178_s30 }
  0x13   : > { %p2986_p11 = pnand %p2462_p9, %p3421_p1  ;;  %p2733_p13 = scmp.ne.s32.totalorder %s155_s25, %s2732_s5 }
  0x14   : > { %p2740_p5 = scmp.lt.s32.totalorder %s155_s25, %s155_s25  ;;  %p2741_p7 = scmp.lt.s32.totalorder %s2732_s5, %s2732_s5 }
  0x15   : > { %p2723_p12 = pneg %p2986_p11 }
  0x16   : > { %p2742_p9 = por %p2741_p7, %p2740_p5 }
  0x17   : > { %p2735_p0 = pnand %p2733_p13, %p2723_p12 }
  0x19   : > { %p2736_p3 = pneg %p2735_p0 }
  0x1b   : > { %p2743_p10 = pnand %p2742_p9, %p2736_p3 }
  0x1d   : > { %2746 = shalt.err (!%p2743_p10)
}
  0x1e   : > { %s2904_s6 = smov 256   ;;  %s2905_s7 = smov 16  }
  0x1f   : > { %2465 = dma.hbm_to_vmem [thread:$0]  (!%p2986_p11), %s3417_s1, 8192, %s155_s25, [#allocation6], %s2904_s6, %s2904_s6, %s2905_s7  }
  0x20   : > { %s2758_s10 = scalar_lea.vmem %s169_s28, 64  ;;  %p2766_p3 = scmp.lt.s32.totalorder %s169_s28, %s169_s28 }
  0x21   : > { %p2759_p13 = scmp.ne.s32.totalorder %s169_s28, %s2758_s10  ;;  %p2767_p10 = scmp.lt.s32.totalorder %s2758_s10, %s2758_s10 }
  0x23   : > { %p2761_p0 = pnand %p2759_p13, %p2723_p12  ;;  %p2768_p7 = por %p2767_p10, %p2766_p3 }
  0x25   : > { %p2762_p5 = pneg %p2761_p0 }
  0x27   : > { %p2769_p9 = pnand %p2768_p7, %p2762_p5 }
  0x29   : > { %2772 = shalt.err (!%p2769_p9)
}
  0x2a   : > { %2468 = dma.hbm_to_vmem [thread:$0]  (!%p2986_p11), %s3418_s2, 64, %s169_s28, [#allocation6]  }
  0x2b   : > { %s2784_s13 = scalar_lea.vmem %s179_s30, 8192  ;;  %p2792_p0 = scmp.lt.s32.totalorder %s179_s30, %s179_s30 }
  0x2c   : > { %p2785_p1 = scmp.ne.s32.totalorder %s179_s30, %s2784_s13  ;;  %p2793_p6 = scmp.lt.s32.totalorder %s2784_s13, %s2784_s13 }
  0x2e   : > { %p2787_p2 = pnand %p2785_p1, %p2723_p12  ;;  %p2794_p4 = por %p2793_p6, %p2792_p0 }
  0x30   : > { %p2788_p13 = pneg %p2787_p2 }
  0x32   : > { %p2795_p3 = pnand %p2794_p4, %p2788_p13 }
  0x34   : > { %2798 = shalt.err (!%p2795_p3)
}
  0x35   : > { %s2906_s14 = smov 128   ;;  %s2907_s20 = smov 8  }
  0x36   : > { %2471 = dma.hbm_to_vmem [thread:$0]  (!%p2986_p11), %s3419_s3, 8192, %s179_s30, [#allocation9], %s2906_s14, %s2906_s14, %s2907_s20  }
  0x37   : > { %s3020_s27 = sadd.s32 1, %s2899_s18   ;;  %s29_s29 = sadd.s32 1, %s2895_s17 }
  0x38   : > { %s26_s28 = ssub.s32 %s2899_s18, %s3020_s27  ;;  %p36_p2 = scmp.ne.s32.totalorder %s2895_s17, %s2891_s16 }
  0x39   : > { %p27_p1 = scmp.eq.s32.totalorder %s26_s28, 0  ;;  %p37_p4 = scmp.eq.s32.totalorder %s2899_s18, 0 }
  0x3a   : > { %p2483_p6 = scmp.lt.s32.totalorder %s2899_s18, 2  ;;  %p3429_p5 = scmp.eq.s32.totalorder %s2958_s19, 1 }
  0x3b   : > { %s3030_s5 = scalar_select %p27_p1, %s2895_s17, %s29_s29  }
  0x3c   : > { %p38_p12 = por %p37_p4, %p36_p2  ;;  %p3034_p10 = por %p3429_p5, %p36_p2 }
  0x3d   : > { %s192_s26 = sand.u32 1, %s2895_s17   ;;  %s2443_s9 = sshll.u32 %s2899_s18, 13 }
  0x3e   : > { %s3430_s8 = scalar_select %p3034_p10, 1, 0 }
  0x3f   : > { %s2298_s30 = sshll.u32 %s192_s26, 9  ;;  %s3043_s12 = scalar_lea.hbm %s3416_s0, %s2443_s9 }
  0x40   : > { %s196_s13 = scalar_lea.vmem [#allocation2], %s2298_s30  ;;  %p3045_p11 = pnand %p2483_p6, %p38_p12 }
  0x41   : > { %s204_s14 = sshll.u32 %s196_s13, 4  ;;  %s3051_s24 = scalar_lea.sflag [#allocation3], %s192_s26  ;;  %s3049_s14 = int_to_ptr.vmem [resolvable:$true] %s204_s14 }
  0x42   : > { %s2799_s25 = scalar_lea.hbm %s3043_s12, 8192  ;;  %p2801_p9 = pneg %p3045_p11 }
  0x43   : > { %p2800_p7 = scmp.ne.s32.totalorder %s3043_s12, %s2799_s25  ;;  %s2804_s9 = scalar_lea.hbm %s3416_s0, 16384 }
  0x44   : > { %p2805_p3 = scmp.lt.s32.totalorder %s3043_s12, %s3416_s0  ;;  %p2806_p1 = scmp.lt.s32.totalorder %s2804_s9, %s2799_s25 }
  0x45   : > { %p2802_p13 = pnand %p2801_p9, %p2800_p7 }
  0x46   : > { %p2807_p2 = por %p2806_p1, %p2805_p3 }
  0x47   : > { %p2803_p0 = pneg %p2802_p13 }
  0x49   : > { %p2808_p4 = pnand %p2807_p2, %p2803_p0 }
  0x4b   : > { %2811 = shalt.err (!%p2808_p4)
}
  0x4c   : > { %s2812_s26 = scalar_lea.vmem %s3049_s14, 8192  ;;  %s2908_s11 = smov [#allocation2]  }
  0x4d   : > { %p2813_p6 = scmp.ne.s32.totalorder %s3049_s14, %s2812_s26  ;;  %s2817_s13 = sshll.u32 %s2908_s11, 4  ;;  %s2818_s13 = int_to_ptr.vmem [resolvable:$false] %s2817_s13 }
  0x4e   : > { %s2819_s28 = scalar_lea.vmem %s2818_s13, 16384  ;;  %p2820_p7 = scmp.lt.s32.totalorder %s3049_s14, %s2818_s13 }
  0x4f   : > { %p2815_p12 = pnand %p2813_p6, %p2801_p9  ;;  %p2821_p13 = scmp.lt.s32.totalorder %s2819_s28, %s2812_s26 }
  0x51   : > { %p2816_p5 = pneg %p2815_p12  ;;  %p2822_p10 = por %p2821_p13, %p2820_p7 }
  0x53   : > { %p2823_p8 = pnand %p2822_p10, %p2816_p5 }
  0x55   : > { %2826 = shalt.err (!%p2823_p8)
}
  0x56   : > { %2475 = dma.hbm_to_vmem [thread:$0]  (!%p3045_p11), %s3043_s12, 8192, %s3049_s14, %s3051_s24, %s2904_s6, %s2904_s6, %s2905_s7  }
  0x57   : > { %p3432_p9 = scmp.ne.s32.totalorder %s3427_s23, 0 }
  0x58   : > { %s3078_s25 = sand.u32 (!%p3432_p9), 1, %s2891_s16   ;;  %p3433_p8 = scmp.ne.s32.totalorder (!%p3432_p9), %s3425_s21, 0 }
  0x59   : > { %216 = sbr.rel (%p3432_p9) target bundleno = 707 (0x2c3), region = 36  ;;  %s2303_s29 = sshll.u32 (!%p3432_p9), %s3078_s25, 9 }
  0x5a   : > { %s219_s9 = scalar_lea.sflag (!%p3432_p9), [#allocation3], %s3078_s25  ;;  %s3084_s20 = scalar_lea.vmem (!%p3432_p9), [#allocation2], %s2303_s29 }
  0x5e   : > { %2870 = dma.done.wait (%p3433_p8), %s219_s9, 8192  }
  0x5f   : > { %2872 = vsyncadd (%p3433_p8), %s219_s9, 4294959104  ;;  %p3434_p10 = scmp.eq.s32.totalorder %s2958_s19, 0 }
  0x61   : > { %2874 = dma.done.wait (%p3434_p10), [#allocation6], 8256   ;;  %p3435_p11 = pmov %p3434_p10 }
  0x62   : > { %p3436_p0 = pmov %p3434_p10 }
  0x63   : > { %2876 = vsyncadd (%p3435_p11), [#allocation6], 4294959040 }
  0x64   : > { %2878 = dma.done.wait (%p3436_p0), [#allocation9], 8192   ;;  %p3437_p3 = pmov %p3436_p0 }
  0x65   : > { %v2529_v0 = vld [vmem:[#allocation5 + $0xe4] ss:$16 sps:$4 sm:$0xff]   ;;  %v2531_v1 = vld [vmem:[#allocation5 + $0xec] ss:$16 sps:$4 sm:$0xff]   ;;  %v2533_v2 = vld [vmem:[#allocation5 + $0xe0] ss:$16 sps:$4 sm:$0xff]  }
  0x66   : > { %2880 = vsyncadd (%p3437_p3), [#allocation9], 4294959104  ;;  %763 = vmatprep.subr.bf16.mxu0 %v2529_v0  ;;  %v2534_v3 = vld [vmem:[#allocation5 + $0xe8] ss:$16 sps:$4 sm:$0xff]   ;;  %956 = vmatprep.subr.bf16.mxu1 %v2531_v1  ;;  %v2535_v4 = vld [vmem:[#allocation5 + $0xc4] ss:$16 sps:$4 sm:$0xff]  }
  0x67   : > { %764 = vmatpush1.bf16.msra.mxu0 %v2533_v2  ;;  %957 = vmatpush1.bf16.msra.mxu1 %v2534_v3  ;;  %v2537_v5 = vld [vmem:[#allocation5 + $0xcc] ss:$16 sps:$4 sm:$0xff]   ;;  %v2539_v6 = vld [vmem:[#allocation5 + $0xc0] ss:$16 sps:$4 sm:$0xff]   ;;  %v2540_v7 = vld [vmem:[#allocation5 + $0xc8] ss:$16 sps:$4 sm:$0xff]  }
  0x68   : > { %765 = vmatprep.subr.bf16.mxu0 %v2535_v4  ;;  %958 = vmatprep.subr.bf16.mxu1 %v2537_v5  ;;  %v2541_v8 = vld [vmem:[#allocation5 + $0xa4] ss:$16 sps:$4 sm:$0xff]   ;;  %v2543_v9 = vld [vmem:[#allocation5 + $0xac] ss:$16 sps:$4 sm:$0xff]   ;;  %v2545_v10 = vld [vmem:[#allocation5 + $0xa0] ss:$16 sps:$4 sm:$0xff]  }
  0x69   : > { %v2546_v11 = vld [vmem:[#allocation5 + $0xa8] ss:$16 sps:$4 sm:$0xff]   ;;  %v2547_v12 = vld [vmem:[#allocation5 + $0x84] ss:$16 sps:$4 sm:$0xff]   ;;  %v2549_v13 = vld [vmem:[#allocation5 + $0x8c] ss:$16 sps:$4 sm:$0xff]  }
  0x6a   : > { %v2551_v14 = vld [vmem:[#allocation5 + $0x80] ss:$16 sps:$4 sm:$0xff]   ;;  %v2552_v15 = vld [vmem:[#allocation5 + $0x88] ss:$16 sps:$4 sm:$0xff]   ;;  %v2553_v16 = vld [vmem:[#allocation5 + $0x64] ss:$16 sps:$4 sm:$0xff]  }
  0x6b   : > { %766 = vmatpush1.bf16.msra.mxu0 %v2539_v6  ;;  %959 = vmatpush1.bf16.msra.mxu1 %v2540_v7  ;;  %v2555_v17 = vld [vmem:[#allocation5 + $0x6c] ss:$16 sps:$4 sm:$0xff]   ;;  %v2557_v18 = vld [vmem:[#allocation5 + $0x60] ss:$16 sps:$4 sm:$0xff]   ;;  %v2558_v19 = vld [vmem:[#allocation5 + $0x68] ss:$16 sps:$4 sm:$0xff]  }
  0x6c   : > { %767 = vmatprep.subr.bf16.mxu0 %v2541_v8  ;;  %960 = vmatprep.subr.bf16.mxu1 %v2543_v9  ;;  %v2559_v20 = vld [vmem:[#allocation5 + $0x44] ss:$16 sps:$4 sm:$0xff]   ;;  %v2561_v21 = vld [vmem:[#allocation5 + $0x4c] ss:$16 sps:$4 sm:$0xff]   ;;  %v2563_v22 = vld [vmem:[#allocation5 + $0x40] ss:$16 sps:$4 sm:$0xff]  }
  0x6d   : > { %v2564_v23 = vld [vmem:[#allocation5 + $0x48] ss:$16 sps:$4 sm:$0xff]   ;;  %v2565_v24 = vld [vmem:[#allocation5 + $0x24] ss:$16 sps:$4 sm:$0xff]   ;;  %v2567_v25 = vld [vmem:[#allocation5 + $0x2c] ss:$16 sps:$4 sm:$0xff]  }
  0x6e   : > { %v2569_v26 = vld [vmem:[#allocation5 + $0x20] ss:$16 sps:$4 sm:$0xff]   ;;  %v2570_v27 = vld [vmem:[#allocation5 + $0x28] ss:$16 sps:$4 sm:$0xff]   ;;  %v2571_v28 = vld [vmem:[#allocation5 + $0x4] ss:$16 sps:$4 sm:$0xff]  }
  0x6f   : > { %768 = vmatpush1.bf16.msra.mxu0 %v2545_v10  ;;  %961 = vmatpush1.bf16.msra.mxu1 %v2546_v11  ;;  %v2573_v29 = vld [vmem:[#allocation5 + $0xc] ss:$16 sps:$4 sm:$0xff]   ;;  %v2575_v30 = vld [vmem:[#allocation5] ss:$16 sps:$4 sm:$0xff]   ;;  %v2576_v31 = vld [vmem:[#allocation5 + $0x8] ss:$16 sps:$4 sm:$0xff]  }
  0x70   : > { %769 = vmatprep.subr.bf16.mxu0 %v2547_v12  ;;  %962 = vmatprep.subr.bf16.mxu1 %v2549_v13  ;;  %v2577_v32 = vld [vmem:[#allocation5 + $0x1e4] ss:$16 sps:$4 sm:$0xff]   ;;  %v2579_v33 = vld [vmem:[#allocation5 + $0x1ec] ss:$16 sps:$4 sm:$0xff]   ;;  %v2581_v34 = vld [vmem:[#allocation5 + $0x1e0] ss:$16 sps:$4 sm:$0xff]  }
  0x71   : > { %v2582_v35 = vld [vmem:[#allocation5 + $0x1e8] ss:$16 sps:$4 sm:$0xff]   ;;  %v2583_v36 = vld [vmem:[#allocation5 + $0x1c4] ss:$16 sps:$4 sm:$0xff]   ;;  %v2585_v37 = vld [vmem:[#allocation5 + $0x1cc] ss:$16 sps:$4 sm:$0xff]  }
  0x72   : > { %v2587_v38 = vld [vmem:[#allocation5 + $0x1c0] ss:$16 sps:$4 sm:$0xff]   ;;  %v2588_v39 = vld [vmem:[#allocation5 + $0x1c8] ss:$16 sps:$4 sm:$0xff]   ;;  %v2589_v40 = vld [vmem:[#allocation5 + $0x1a4] ss:$16 sps:$4 sm:$0xff]  }
  0x73   : > { %770 = vmatpush1.bf16.msra.mxu0 %v2551_v14  ;;  %963 = vmatpush1.bf16.msra.mxu1 %v2552_v15  ;;  %v2591_v41 = vld [vmem:[#allocation5 + $0x1ac] ss:$16 sps:$4 sm:$0xff]   ;;  %v2593_v42 = vld [vmem:[#allocation5 + $0x1a0] ss:$16 sps:$4 sm:$0xff]   ;;  %v2594_v43 = vld [vmem:[#allocation5 + $0x1a8] ss:$16 sps:$4 sm:$0xff]  }
  0x74   : > { %771 = vmatprep.subr.bf16.mxu0 %v2553_v16  ;;  %964 = vmatprep.subr.bf16.mxu1 %v2555_v17  ;;  %v2595_v44 = vld [vmem:[#allocation5 + $0x184] ss:$16 sps:$4 sm:$0xff]   ;;  %v2597_v45 = vld [vmem:[#allocation5 + $0x18c] ss:$16 sps:$4 sm:$0xff]   ;;  %v2599_v48 = vld [vmem:[#allocation5 + $0x180] ss:$16 sps:$4 sm:$0xff]  }
  0x75   : > { %v262_v46 = vld [vmem:[%s3084_s20 + $0x8] sm:$0xff]  ;;  %v264_v47 = vld [vmem:[%s3084_s20 + $0x18] sm:$0xff]  ;;  %v2601_v51 = vld [vmem:[#allocation5 + $0x164] ss:$16 sps:$4 sm:$0xff]   ;;  %s3300_s21 = scalar_lea.vmem [#allocation10], %s2303_s29  ;;  %s2445_s23 = sshll.u32 %s2958_s19, 13 }
  0x76   : > { %v2600_v49 = vld [vmem:[#allocation5 + $0x188] ss:$16 sps:$4 sm:$0xff]   ;;  %v326_v50 = vpack.c.bf16 %v264_v47, %v262_v46  ;;  %v2603_v52 = vld [vmem:[#allocation5 + $0x16c] ss:$16 sps:$4 sm:$0xff]   ;;  %v2605_v53 = vld [vmem:[#allocation5 + $0x160] ss:$16 sps:$4 sm:$0xff]   ;;  %s3369_s14 = scalar_lea.hbm %s3420_s4, %s2445_s23 }
  0x77   : > { %772 = vmatpush1.bf16.msra.mxu0 %v2557_v18  ;;  %965 = vmatpush1.bf16.msra.mxu1 %v2558_v19  ;;  %v2606_v54 = vld [vmem:[#allocation5 + $0x168] ss:$16 sps:$4 sm:$0xff]   ;;  %v2607_v55 = vld [vmem:[#allocation5 + $0x144] ss:$16 sps:$4 sm:$0xff]   ;;  %v2609_v56 = vld [vmem:[#allocation5 + $0x14c] ss:$16 sps:$4 sm:$0xff]  }
  0x78   : > { %773 = vmatprep.subr.bf16.mxu0 %v2559_v20  ;;  %966 = vmatprep.subr.bf16.mxu1 %v2561_v21  ;;  %v2611_v57 = vld [vmem:[#allocation5 + $0x140] ss:$16 sps:$4 sm:$0xff]   ;;  %v2612_v58 = vld [vmem:[#allocation5 + $0x148] ss:$16 sps:$4 sm:$0xff]   ;;  %v2613_v59 = vld [vmem:[#allocation5 + $0x124] ss:$16 sps:$4 sm:$0xff]  }
  0x79   : > { %795 = vmatprep.mubr.bf16.mxu0 %v326_v50  ;;  %988 = vmatprep.mubr.bf16.mxu1 %v326_v50  ;;  %v2615_v60 = vld [vmem:[#allocation5 + $0x12c] ss:$16 sps:$4 sm:$0xff]   ;;  %v2617_v61 = vld [vmem:[#allocation5 + $0x120] ss:$16 sps:$4 sm:$0xff]   ;;  %v2618_v62 = vld [vmem:[#allocation5 + $0x128] ss:$16 sps:$4 sm:$0xff]  }
  0x7a   : > { %v2619_v63 = vld [vmem:[#allocation5 + $0x104] ss:$16 sps:$4 sm:$0xff]   ;;  %v2621_v0 = vld [vmem:[#allocation5 + $0x10c] ss:$16 sps:$4 sm:$0xff]   ;;  %v2623_v1 = vld [vmem:[#allocation5 + $0x100] ss:$16 sps:$4 sm:$0xff]  }
  0x7b   : > { %774 = vmatpush1.bf16.msra.mxu0 %v2563_v22  ;;  %967 = vmatpush1.bf16.msra.mxu1 %v2564_v23  ;;  %v2624_v2 = vld [vmem:[#allocation5 + $0x108] ss:$16 sps:$4 sm:$0xff]   ;;  %v261_v3 = vld [vmem:[%s3084_s20] sm:$0xff]  ;;  %v263_v4 = vld [vmem:[%s3084_s20 + $0x10] sm:$0xff]  ;;  %s2190_s6 = sshll.u32 %s3300_s21, 4  ;;  %s2176_s19 = scalar_lea.sflag [#allocation4], %s3078_s25  ;;  %s3371_s6 = int_to_ptr.vmem [resolvable:$true] %s2190_s6 }
  0x7c   : > { %775 = vmatprep.subr.bf16.mxu0 %v2565_v24  ;;  %968 = vmatprep.subr.bf16.mxu1 %v2567_v25  ;;  %v266_v5 = vld [vmem:[%s3084_s20 + $0x28] sm:$0xff]  ;;  %v268_v6 = vld [vmem:[%s3084_s20 + $0x38] sm:$0xff]  ;;  %v325_v9 = vpack.c.bf16 %v263_v4, %v261_v3  ;;  %v265_v13 = vld [vmem:[%s3084_s20 + $0x20] sm:$0xff]  ;;  %s2827_s24 = scalar_lea.vmem %s3371_s6, 8192  ;;  %p3438_p2 = scmp.ne.s32.totalorder %s3430_s8, 0 }
  0x7d   : > { %v2627_v7 = vld [vmem:[#allocation8 + $0x74] ss:$8 sps:$4 sm:$0xff]   ;;  %v328_v10 = vpack.c.bf16 %v268_v6, %v266_v5  ;;  %v2625_v11 = vld [vmem:[#allocation8 + $0x70] ss:$8 sps:$4 sm:$0xff]   ;;  %v2633_v14 = vld [vmem:[#allocation8 + $0x64] ss:$8 sps:$4 sm:$0xff]   ;;  %p2828_p1 = scmp.ne.s32.totalorder %s3371_s6, %s2827_s24 }
  0x7e   : > { %v2630_v8 = vld [vmem:[#allocation8 + $0x174] ss:$8 sps:$4 sm:$0xff]   ;;  %v2628_v12 = vld [vmem:[#allocation8 + $0x170] ss:$8 sps:$4 sm:$0xff]   ;;  %v2636_v15 = vld [vmem:[#allocation8 + $0x164] ss:$8 sps:$4 sm:$0xff]  }
  0x7f   : > { %776 = vmatpush1.bf16.msra.mxu0 %v2569_v26  ;;  %969 = vmatpush1.bf16.msra.mxu1 %v2570_v27  ;;  %v267_v16 = vld [vmem:[%s3084_s20 + $0x30] sm:$0xff]  ;;  %v270_v17 = vld [vmem:[%s3084_s20 + $0x48] sm:$0xff]  ;;  %v272_v18 = vld [vmem:[%s3084_s20 + $0x58] sm:$0xff]  ;;  %p2829_p4 = pnand %p2828_p1, %p3438_p2  ;;  %s2909_s30 = smov [#allocation10]  }
  0x80   : > { %777 = vmatprep.subr.bf16.mxu0 %v2571_v28  ;;  %970 = vmatprep.subr.bf16.mxu1 %v2573_v29  ;;  %v2631_v19 = vld [vmem:[#allocation8 + $0x60] ss:$8 sps:$4 sm:$0xff]   ;;  %v2639_v21 = vld [vmem:[#allocation8 + $0x54] ss:$8 sps:$4 sm:$0xff]   ;;  %v327_v23 = vpack.c.bf16 %v267_v16, %v265_v13  ;;  %v330_v24 = vpack.c.bf16 %v272_v18, %v270_v17  ;;  %v2637_v25 = vld [vmem:[#allocation8 + $0x50] ss:$8 sps:$4 sm:$0xff]  }
  0x81   : > { %v2634_v20 = vld [vmem:[#allocation8 + $0x160] ss:$8 sps:$4 sm:$0xff]   ;;  %v2642_v22 = vld [vmem:[#allocation8 + $0x154] ss:$8 sps:$4 sm:$0xff]   ;;  %v2640_v26 = vld [vmem:[#allocation8 + $0x150] ss:$8 sps:$4 sm:$0xff]   ;;  %p2830_p6 = pneg %p2829_p4 }
  0x82   : > { %v269_v27 = vld [vmem:[%s3084_s20 + $0x40] sm:$0xff]  ;;  %v2645_v28 = vld [vmem:[#allocation8 + $0x44] ss:$8 sps:$4 sm:$0xff]   ;;  %v280_v46 = vld [vmem:[%s3084_s20 + $0x98] sm:$0xff]  ;;  %s2831_s10 = sshll.u32 %s2909_s30, 4  ;;  %s2832_s10 = int_to_ptr.vmem [resolvable:$false] %s2831_s10 }
  0x83   : > { %778 = vmatpush1.bf16.msra.mxu0 %v2575_v30  ;;  %971 = vmatpush1.bf16.msra.mxu1 %v2576_v31  ;;  %v2648_v29 = vld [vmem:[#allocation8 + $0x144] ss:$8 sps:$4 sm:$0xff]   ;;  %v2655_v47 = vld [vmem:[#allocation8 + $0x20] ss:$8 sps:$4 sm:$0xff]   ;;  %v2666_v50 = vld [vmem:[#allocation8 + $0x114] ss:$8 sps:$4 sm:$0xff]   ;;  %p2834_p12 = scmp.lt.s32.totalorder %s3371_s6, %s2832_s10 }
  0x84   : > { %779 = vmatprep.subr.bf16.mxu0 %v2577_v32  ;;  %972 = vmatprep.subr.bf16.mxu1 %v2579_v33  ;;  %v271_v30 = vld [vmem:[%s3084_s20 + $0x50] sm:$0xff]  ;;  %v274_v31 = vld [vmem:[%s3084_s20 + $0x68] sm:$0xff]  ;;  %v276_v32 = vld [vmem:[%s3084_s20 + $0x78] sm:$0xff]  ;;  %s2833_s26 = scalar_lea.vmem %s2832_s10, 16384 }
  0x85   : > { %v2643_v33 = vld [vmem:[#allocation8 + $0x40] ss:$8 sps:$4 sm:$0xff]   ;;  %v2673_v3 = vld [vmem:[#allocation8 + $0xf0] ss:$8 sps:$4 sm:$0xff]   ;;  %v2687_v13 = vld [vmem:[#allocation8 + $0xd4] ss:$8 sps:$4 sm:$0xff]   ;;  %p2835_p5 = scmp.lt.s32.totalorder %s2833_s26, %s2827_s24 }
  0x86   : > { %v2676_v4 = vld [vmem:[#allocation8 + $0x1f0] ss:$8 sps:$4 sm:$0xff]   ;;  %v281_v5 = vld [vmem:[%s3084_s20 + $0xa0] sm:$0xff] }
  0x87   : > { %780 = vmatpush2.bf16.msra.mxu0 %v2581_v34  ;;  %973 = vmatpush2.bf16.msra.mxu1 %v2582_v35  ;;  %v2646_v34 = vld [vmem:[#allocation8 + $0x140] ss:$8 sps:$4 sm:$0xff]   ;;  %v2651_v35 = vld [vmem:[#allocation8 + $0x34] ss:$8 sps:$4 sm:$0xff]   ;;  %v283_v6 = vld [vmem:[%s3084_s20 + $0xb0] sm:$0xff]  ;;  %p2836_p7 = por %p2835_p5, %p2834_p12 }
  0x88   : > { %781 = vmatprep.subr.bf16.mxu0 %v2583_v36  ;;  %974 = vmatprep.subr.bf16.mxu1 %v2585_v37  ;;  %v2654_v36 = vld [vmem:[#allocation8 + $0x134] ss:$8 sps:$4 sm:$0xff]   ;;  %v329_v37 = vpack.c.bf16 %v271_v30, %v269_v27  ;;  %v2685_v17 = vld [vmem:[#allocation8 + $0xd0] ss:$8 sps:$4 sm:$0xff]  }
  0x89   : > { %v2688_v18 = vld [vmem:[#allocation8 + $0x1d0] ss:$8 sps:$4 sm:$0xff]   ;;  %v2699_v27 = vld [vmem:[#allocation8 + $0xb4] ss:$8 sps:$4 sm:$0xff]   ;;  %p2837_p13 = pnand %p2836_p7, %p2830_p6 }
  0x8b   : > { %782 = vmatpush2.bf16.msra.mxu0 %v2587_v38  ;;  %975 = vmatpush2.bf16.msra.mxu1 %v2588_v39  ;;  %v332_v38 = vpack.c.bf16 %v276_v32, %v274_v31  ;;  %v2649_v39 = vld [vmem:[#allocation8 + $0x30] ss:$8 sps:$4 sm:$0xff]  }
  0x8c   : > { %783 = vmatprep.subr.bf16.mxu0 %v2589_v40  ;;  %976 = vmatprep.subr.bf16.mxu1 %v2591_v41  ;;  %v2652_v40 = vld [vmem:[#allocation8 + $0x130] ss:$8 sps:$4 sm:$0xff]   ;;  %v273_v41 = vld [vmem:[%s3084_s20 + $0x60] sm:$0xff] }
  0x8d   : > { %v2697_v31 = vld [vmem:[#allocation8 + $0xb0] ss:$8 sps:$4 sm:$0xff]  }
  0x8e   : > { %v2700_v32 = vld [vmem:[#allocation8 + $0x1b0] ss:$8 sps:$4 sm:$0xff]  }
  0x8f   : > { %784 = vmatpush2.bf16.msra.mxu0 %v2593_v42  ;;  %977 = vmatpush2.bf16.msra.mxu1 %v2594_v43  ;;  %v275_v42 = vld [vmem:[%s3084_s20 + $0x70] sm:$0xff] }
  0x90   : > { %785 = vmatprep.subr.bf16.mxu0 %v2595_v44  ;;  %978 = vmatprep.subr.bf16.mxu1 %v2597_v45  ;;  %v2657_v43 = vld [vmem:[#allocation8 + $0x24] ss:$8 sps:$4 sm:$0xff]  }
  0x91   : > { %v2660_v44 = vld [vmem:[#allocation8 + $0x124] ss:$8 sps:$4 sm:$0xff]  }
  0x92   : > { %v278_v45 = vld [vmem:[%s3084_s20 + $0x88] sm:$0xff] }
  0x93   : > { %786 = vmatpush2.bf16.msra.mxu0 %v2599_v48  ;;  %979 = vmatpush2.bf16.msra.mxu1 %v2600_v49  ;;  %v2658_v48 = vld [vmem:[#allocation8 + $0x120] ss:$8 sps:$4 sm:$0xff]   ;;  %v2663_v49 = vld [vmem:[#allocation8 + $0x14] ss:$8 sps:$4 sm:$0xff]  }
  0x94   : > { %787 = vmatprep.subr.bf16.mxu0 %v2601_v51  ;;  %980 = vmatprep.subr.bf16.mxu1 %v2603_v52  ;;  %v331_v51 = vpack.c.bf16 %v275_v42, %v273_v41  ;;  %v334_v52 = vpack.c.bf16 %v280_v46, %v278_v45  ;;  %v2711_v41 = vld [vmem:[#allocation8 + $0x94] ss:$8 sps:$4 sm:$0xff]   ;;  %v2709_v45 = vld [vmem:[#allocation8 + $0x90] ss:$8 sps:$4 sm:$0xff]  }
  0x95   : > { %v2714_v42 = vld [vmem:[#allocation8 + $0x194] ss:$8 sps:$4 sm:$0xff]   ;;  %v2712_v46 = vld [vmem:[#allocation8 + $0x190] ss:$8 sps:$4 sm:$0xff]  }
  0x97   : > { %788 = vmatpush2.bf16.msra.mxu0 %v2605_v53  ;;  %981 = vmatpush2.bf16.msra.mxu1 %v2606_v54  ;;  %v2661_v53 = vld [vmem:[#allocation8 + $0x10] ss:$8 sps:$4 sm:$0xff]  }
  0x98   : > { %789 = vmatprep.subr.bf16.mxu0 %v2607_v55  ;;  %982 = vmatprep.subr.bf16.mxu1 %v2609_v56  ;;  %v2664_v54 = vld [vmem:[#allocation8 + $0x110] ss:$8 sps:$4 sm:$0xff]   ;;  %v277_v55 = vld [vmem:[%s3084_s20 + $0x80] sm:$0xff] }
  0x99   : > { %v279_v56 = vld [vmem:[%s3084_s20 + $0x90] sm:$0xff] }
  0x9b   : > { %790 = vmatpush2.bf16.msra.mxu0 %v2611_v57  ;;  %983 = vmatpush2.bf16.msra.mxu1 %v2612_v58  ;;  %v2669_v57 = vld [vmem:[#allocation8 + $0x4] ss:$8 sps:$4 sm:$0xff]  }
  0x9c   : > { %791 = vmatprep.subr.bf16.mxu0 %v2613_v59  ;;  %984 = vmatprep.subr.bf16.mxu1 %v2615_v60  ;;  %v2672_v58 = vld [vmem:[#allocation8 + $0x104] ss:$8 sps:$4 sm:$0xff]   ;;  %v284_v60 = vld [vmem:[%s3084_s20 + $0xb8] sm:$0xff] }
  0x9d   : > { %v282_v59 = vld [vmem:[%s3084_s20 + $0xa8] sm:$0xff] }
  0x9f   : > { %792 = vmatpush2.bf16.msra.mxu0 %v2617_v61  ;;  %985 = vmatpush2.bf16.msra.mxu1 %v2618_v62  ;;  %v2667_v61 = vld [vmem:[#allocation8] ss:$8 sps:$4 sm:$0xff]  }
  0xa0   : > { %793 = vmatprep.subr.bf16.mxu0 %v2619_v63  ;;  %986 = vmatprep.subr.bf16.mxu1 %v2621_v0  ;;  %v2670_v62 = vld [vmem:[#allocation8 + $0x100] ss:$8 sps:$4 sm:$0xff]   ;;  %v2675_v63 = vld [vmem:[#allocation8 + $0xf4] ss:$8 sps:$4 sm:$0xff]  }
  0xa1   : > { %v2678_v0 = vld [vmem:[#allocation8 + $0x1f4] ss:$8 sps:$4 sm:$0xff]  }
  0xa3   : > { %794 = vmatpush2.bf16.msra.mxu0 %v2623_v1  ;;  %987 = vmatpush2.bf16.msra.mxu1 %v2624_v2  ;;  %v333_v1 = vpack.c.bf16 %v279_v56, %v277_v55  ;;  %v336_v2 = vpack.c.bf16 %v284_v60, %v282_v59  ;;  %v302_v55 = vld [vmem:[%s3084_s20 + $0x148] sm:$0xff]  ;;  %v304_v56 = vld [vmem:[%s3084_s20 + $0x158] sm:$0xff]  ;;  %v301_v59 = vld [vmem:[%s3084_s20 + $0x140] sm:$0xff] }
  0xa4   : > { %1725 = vmatprep.subr.bf16.mxu0 %v2627_v7  ;;  %1918 = vmatprep.subr.bf16.mxu1 %v2630_v8  ;;  %v2681_v7 = vld [vmem:[#allocation8 + $0xe4] ss:$8 sps:$4 sm:$0xff]  }
  0xa5   : > { %v2684_v8 = vld [vmem:[#allocation8 + $0x1e4] ss:$8 sps:$4 sm:$0xff]  }
  0xa6   : > { %796 = vmatmul.mubr.bf16.vlgmr.msra.gmra.mxu0 %v325_v9  ;;  %989 = vmatmul.mubr.bf16.vlgmr.msra.gmra.mxu1 %v325_v9  ;;  %v286_v9 = vld [vmem:[%s3084_s20 + $0xc8] sm:$0xff] }
  0xa7   : > { %805 = vmatprep.mubr.bf16.mxu0 %v328_v10  ;;  %998 = vmatprep.mubr.bf16.mxu1 %v328_v10  ;;  %v288_v10 = vld [vmem:[%s3084_s20 + $0xd8] sm:$0xff]  ;;  %v2717_v60 = vld [vmem:[#allocation8 + $0x84] ss:$8 sps:$4 sm:$0xff]  }
  0xa8   : > { %1726 = vmatpush1.bf16.msra.mxu0 %v2625_v11  ;;  %1919 = vmatpush1.bf16.msra.mxu1 %v2628_v12  ;;  %v2679_v11 = vld [vmem:[#allocation8 + $0xe0] ss:$8 sps:$4 sm:$0xff]   ;;  %v338_v16 = vpack.c.bf16 %v288_v10, %v286_v9 }
  0xa9   : > { %1727 = vmatprep.subr.bf16.mxu0 %v2633_v14  ;;  %1920 = vmatprep.subr.bf16.mxu1 %v2636_v15  ;;  %v2682_v12 = vld [vmem:[#allocation8 + $0x1e0] ss:$8 sps:$4 sm:$0xff]   ;;  %v2690_v14 = vld [vmem:[#allocation8 + $0x1d4] ss:$8 sps:$4 sm:$0xff]   ;;  %v335_v15 = vpack.c.bf16 %v283_v6, %v281_v5  ;;  %v307_v6 = vld [vmem:[%s3084_s20 + $0x170] sm:$0xff] }
  0xaa   : > { %v305_v5 = vld [vmem:[%s3084_s20 + $0x160] sm:$0xff] }
  0xab   : > { %v347_v9 = vpack.c.bf16 %v307_v6, %v305_v5 }
  0xac   : > { %1728 = vmatpush1.bf16.msra.mxu0 %v2631_v19  ;;  %1921 = vmatpush1.bf16.msra.mxu1 %v2634_v20  ;;  %v2693_v19 = vld [vmem:[#allocation8 + $0xc4] ss:$8 sps:$4 sm:$0xff]  }
  0xad   : > { %1729 = vmatprep.subr.bf16.mxu0 %v2639_v21  ;;  %1922 = vmatprep.subr.bf16.mxu1 %v2642_v22  ;;  %v2696_v20 = vld [vmem:[#allocation8 + $0x1c4] ss:$8 sps:$4 sm:$0xff]   ;;  %v285_v21 = vld [vmem:[%s3084_s20 + $0xc0] sm:$0xff] }
  0xae   : > { %806 = vmatmul.mubr.bf16.gmra.mxu0 %v327_v23  ;;  %999 = vmatmul.mubr.bf16.gmra.mxu1 %v327_v23  ;;  %v287_v22 = vld [vmem:[%s3084_s20 + $0xd0] sm:$0xff]  ;;  %v290_v23 = vld [vmem:[%s3084_s20 + $0xe8] sm:$0xff] }
  0xaf   : > { %815 = vmatprep.mubr.bf16.mxu0 %v330_v24  ;;  %1008 = vmatprep.mubr.bf16.mxu1 %v330_v24  ;;  %v292_v24 = vld [vmem:[%s3084_s20 + $0xf8] sm:$0xff] }
  0xb0   : > { %1730 = vmatpush1.bf16.msra.mxu0 %v2637_v25  ;;  %1923 = vmatpush1.bf16.msra.mxu1 %v2640_v26  ;;  %v2691_v25 = vld [vmem:[#allocation8 + $0xc0] ss:$8 sps:$4 sm:$0xff]   ;;  %v340_v30 = vpack.c.bf16 %v292_v24, %v290_v23  ;;  %v319_v24 = vld [vmem:[%s3084_s20 + $0x1d0] sm:$0xff] }
  0xb1   : > { %1731 = vmatprep.subr.bf16.mxu0 %v2645_v28  ;;  %1924 = vmatprep.subr.bf16.mxu1 %v2648_v29  ;;  %v2694_v26 = vld [vmem:[#allocation8 + $0x1c0] ss:$8 sps:$4 sm:$0xff]   ;;  %v2702_v28 = vld [vmem:[#allocation8 + $0x1b4] ss:$8 sps:$4 sm:$0xff]   ;;  %v337_v29 = vpack.c.bf16 %v287_v22, %v285_v21 }
  0xb2   : > { %v317_v23 = vld [vmem:[%s3084_s20 + $0x1c0] sm:$0xff] }
  0xb4   : > { %1732 = vmatpush1.bf16.msra.mxu0 %v2643_v33  ;;  %1925 = vmatpush1.bf16.msra.mxu1 %v2646_v34  ;;  %v2705_v33 = vld [vmem:[#allocation8 + $0xa4] ss:$8 sps:$4 sm:$0xff]  }
  0xb5   : > { %1733 = vmatprep.subr.bf16.mxu0 %v2651_v35  ;;  %1926 = vmatprep.subr.bf16.mxu1 %v2654_v36  ;;  %v2708_v34 = vld [vmem:[#allocation8 + $0x1a4] ss:$8 sps:$4 sm:$0xff]   ;;  %v289_v35 = vld [vmem:[%s3084_s20 + $0xe0] sm:$0xff] }
  0xb6   : > { %816 = vmatmul.mubr.bf16.gmra.mxu0 %v329_v37  ;;  %1009 = vmatmul.mubr.bf16.gmra.mxu1 %v329_v37  ;;  %v291_v36 = vld [vmem:[%s3084_s20 + $0xf0] sm:$0xff]  ;;  %v294_v37 = vld [vmem:[%s3084_s20 + $0x108] sm:$0xff] }
  0xb7   : > { %825 = vmatprep.mubr.bf16.mxu0 %v332_v38  ;;  %1018 = vmatprep.mubr.bf16.mxu1 %v332_v38  ;;  %v296_v38 = vld [vmem:[%s3084_s20 + $0x118] sm:$0xff] }
  0xb8   : > { %1734 = vmatpush1.bf16.msra.mxu0 %v2649_v39  ;;  %1927 = vmatpush1.bf16.msra.mxu1 %v2652_v40  ;;  %v2703_v39 = vld [vmem:[#allocation8 + $0xa0] ss:$8 sps:$4 sm:$0xff]  }
  0xb9   : > { %1735 = vmatprep.subr.bf16.mxu0 %v2657_v43  ;;  %1928 = vmatprep.subr.bf16.mxu1 %v2660_v44  ;;  %v2706_v40 = vld [vmem:[#allocation8 + $0x1a0] ss:$8 sps:$4 sm:$0xff]   ;;  %v339_v43 = vpack.c.bf16 %v291_v36, %v289_v35  ;;  %v342_v44 = vpack.c.bf16 %v296_v38, %v294_v37  ;;  %v421_v38 = vld [vmem:[#allocation7] sm:$0xf] }
  0xbc   : > { %1736 = vmatpush1.bf16.msra.mxu0 %v2655_v47  ;;  %1929 = vmatpush1.bf16.msra.mxu1 %v2658_v48  ;;  %v293_v47 = vld [vmem:[%s3084_s20 + $0x100] sm:$0xff]  ;;  %v295_v48 = vld [vmem:[%s3084_s20 + $0x110] sm:$0xff] }
  0xbd   : > { %1737 = vmatprep.subr.bf16.mxu0 %v2663_v49  ;;  %1930 = vmatprep.subr.bf16.mxu1 %v2666_v50  ;;  %v298_v49 = vld [vmem:[%s3084_s20 + $0x128] sm:$0xff]  ;;  %v300_v50 = vld [vmem:[%s3084_s20 + $0x138] sm:$0xff] }
  0xbe   : > { %826 = vmatmul.mubr.bf16.gmra.mxu0 %v331_v51  ;;  %1019 = vmatmul.mubr.bf16.gmra.mxu1 %v331_v51  ;;  %v341_v51 = vpack.c.bf16 %v295_v48, %v293_v47 }
  0xbf   : > { %835 = vmatprep.mubr.bf16.mxu0 %v334_v52  ;;  %1028 = vmatprep.mubr.bf16.mxu1 %v334_v52  ;;  %v344_v52 = vpack.c.bf16 %v300_v50, %v298_v49 }
  0xc0   : > { %1738 = vmatpush1.bf16.msra.mxu0 %v2661_v53  ;;  %1931 = vmatpush1.bf16.msra.mxu1 %v2664_v54  ;;  %v297_v53 = vld [vmem:[%s3084_s20 + $0x120] sm:$0xff]  ;;  %v299_v54 = vld [vmem:[%s3084_s20 + $0x130] sm:$0xff] }
  0xc1   : > { %1739 = vmatprep.subr.bf16.mxu0 %v2669_v57  ;;  %1932 = vmatprep.subr.bf16.mxu1 %v2672_v58  ;;  %v343_v57 = vpack.c.bf16 %v299_v54, %v297_v53  ;;  %v346_v58 = vpack.c.bf16 %v304_v56, %v302_v55 }
  0xc4   : > { %1740 = vmatpush1.bf16.msra.mxu0 %v2667_v61  ;;  %1933 = vmatpush1.bf16.msra.mxu1 %v2670_v62  ;;  %v2720_v61 = vld [vmem:[#allocation8 + $0x184] ss:$8 sps:$4 sm:$0xff]  }
  0xc5   : > { %1741 = vmatprep.subr.bf16.mxu0 %v2675_v63  ;;  %1934 = vmatprep.subr.bf16.mxu1 %v2678_v0  ;;  %v303_v62 = vld [vmem:[%s3084_s20 + $0x150] sm:$0xff]  ;;  %v2715_v63 = vld [vmem:[#allocation8 + $0x80] ss:$8 sps:$4 sm:$0xff]  }
  0xc6   : > { %836 = vmatmul.mubr.bf16.gmra.mxu0 %v333_v1  ;;  %1029 = vmatmul.mubr.bf16.gmra.mxu1 %v333_v1  ;;  %v2718_v0 = vld [vmem:[#allocation8 + $0x180] ss:$8 sps:$4 sm:$0xff]  }
  0xc7   : > { %845 = vmatprep.mubr.bf16.mxu0 %v336_v2  ;;  %1038 = vmatprep.mubr.bf16.mxu1 %v336_v2  ;;  %v306_v1 = vld [vmem:[%s3084_s20 + $0x168] sm:$0xff]  ;;  %v308_v2 = vld [vmem:[%s3084_s20 + $0x178] sm:$0xff] }
  0xc8   : > { %1742 = vmatpush2.bf16.msra.mxu0 %v2673_v3  ;;  %1935 = vmatpush2.bf16.msra.mxu1 %v2676_v4  ;;  %v345_v3 = vpack.c.bf16 %v303_v62, %v301_v59  ;;  %v348_v4 = vpack.c.bf16 %v308_v2, %v306_v1 }
  0xc9   : > { %1743 = vmatprep.subr.bf16.mxu0 %v2681_v7  ;;  %1936 = vmatprep.subr.bf16.mxu1 %v2684_v8  ;;  %v310_v7 = vld [vmem:[%s3084_s20 + $0x188] sm:$0xff]  ;;  %v312_v8 = vld [vmem:[%s3084_s20 + $0x198] sm:$0xff] }
  0xca   : > { %v350_v10 = vpack.c.bf16 %v312_v8, %v310_v7 }
  0xcc   : > { %1744 = vmatpush2.bf16.msra.mxu0 %v2679_v11  ;;  %1937 = vmatpush2.bf16.msra.mxu1 %v2682_v12  ;;  %v309_v11 = vld [vmem:[%s3084_s20 + $0x180] sm:$0xff]  ;;  %v311_v12 = vld [vmem:[%s3084_s20 + $0x190] sm:$0xff] }
  0xcd   : > { %1745 = vmatprep.subr.bf16.mxu0 %v2687_v13  ;;  %1938 = vmatprep.subr.bf16.mxu1 %v2690_v14  ;;  %v314_v13 = vld [vmem:[%s3084_s20 + $0x1a8] sm:$0xff]  ;;  %v316_v14 = vld [vmem:[%s3084_s20 + $0x1b8] sm:$0xff] }
  0xce   : > { %846 = vmatmul.mubr.bf16.gmra.mxu0 %v335_v15  ;;  %1039 = vmatmul.mubr.bf16.gmra.mxu1 %v335_v15  ;;  %v349_v15 = vpack.c.bf16 %v311_v12, %v309_v11 }
  0xcf   : > { %855 = vmatprep.mubr.bf16.mxu0 %v338_v16  ;;  %1048 = vmatprep.mubr.bf16.mxu1 %v338_v16  ;;  %v352_v16 = vpack.c.bf16 %v316_v14, %v314_v13 }
  0xd0   : > { %1746 = vmatpush2.bf16.msra.mxu0 %v2685_v17  ;;  %1939 = vmatpush2.bf16.msra.mxu1 %v2688_v18  ;;  %v313_v17 = vld [vmem:[%s3084_s20 + $0x1a0] sm:$0xff]  ;;  %v315_v18 = vld [vmem:[%s3084_s20 + $0x1b0] sm:$0xff] }
  0xd1   : > { %1747 = vmatprep.subr.bf16.mxu0 %v2693_v19  ;;  %1940 = vmatprep.subr.bf16.mxu1 %v2696_v20  ;;  %v318_v19 = vld [vmem:[%s3084_s20 + $0x1c8] sm:$0xff]  ;;  %v320_v20 = vld [vmem:[%s3084_s20 + $0x1d8] sm:$0xff]  ;;  %v351_v21 = vpack.c.bf16 %v315_v18, %v313_v17 }
  0xd2   : > { %v354_v22 = vpack.c.bf16 %v320_v20, %v318_v19 }
  0xd4   : > { %1748 = vmatpush2.bf16.msra.mxu0 %v2691_v25  ;;  %1941 = vmatpush2.bf16.msra.mxu1 %v2694_v26  ;;  %v322_v25 = vld [vmem:[%s3084_s20 + $0x1e8] sm:$0xff]  ;;  %v324_v26 = vld [vmem:[%s3084_s20 + $0x1f8] sm:$0xff] }
  0xd5   : > { %1749 = vmatprep.subr.bf16.mxu0 %v2699_v27  ;;  %1942 = vmatprep.subr.bf16.mxu1 %v2702_v28  ;;  %v353_v27 = vpack.c.bf16 %v319_v24, %v317_v23  ;;  %v356_v28 = vpack.c.bf16 %v324_v26, %v322_v25 }
  0xd6   : > { %856 = vmatmul.mubr.bf16.gmra.mxu0 %v337_v29  ;;  %1049 = vmatmul.mubr.bf16.gmra.mxu1 %v337_v29  ;;  %v321_v29 = vld [vmem:[%s3084_s20 + $0x1e0] sm:$0xff] }
  0xd7   : > { %865 = vmatprep.mubr.bf16.mxu0 %v340_v30  ;;  %1058 = vmatprep.mubr.bf16.mxu1 %v340_v30  ;;  %v323_v30 = vld [vmem:[%s3084_s20 + $0x1f0] sm:$0xff] }
  0xd8   : > { %1750 = vmatpush2.bf16.msra.mxu0 %v2697_v31  ;;  %1943 = vmatpush2.bf16.msra.mxu1 %v2700_v32  ;;  %v355_v31 = vpack.c.bf16 %v323_v30, %v321_v29  ;;  %v423_v32 = vlaneseq }
  0xd9   : > { %1751 = vmatprep.subr.bf16.mxu0 %v2705_v33  ;;  %1944 = vmatprep.subr.bf16.mxu1 %v2708_v34 }
  0xda   : > { %v424_v33 = vshrl.u32 %v423_v32, 7 }
  0xdc   : > { %1752 = vmatpush2.bf16.msra.mxu0 %v2703_v39  ;;  %1945 = vmatpush2.bf16.msra.mxu1 %v2706_v40  ;;  %v429_v34 = vsub.s32 1, %v424_v33  ;;  %v437_v35 = vsub.s32 3, %v424_v33  ;;  %v425_v36 = vsub.s32 0, %v424_v33  ;;  %v433_v37 = vsub.s32 2, %v424_v33 }
  0xdd   : > { %1753 = vmatprep.subr.bf16.mxu0 %v2711_v41  ;;  %1946 = vmatprep.subr.bf16.mxu1 %v2714_v42 }
  0xde   : > { %866 = vmatmul.mubr.bf16.gmra.mxu0 %v339_v43  ;;  %1059 = vmatmul.mubr.bf16.gmra.mxu1 %v339_v43  ;;  %v3162_v41 = vrot.slane %v421_v38, %v429_v34  ;;  %v3164_v42 = vrot.slane %v421_v38, %v437_v35  ;;  %v3166_v43 = vrot.slane %v421_v38, %v425_v36 }
  0xdf   : > { %875 = vmatprep.mubr.bf16.mxu0 %v342_v44  ;;  %1068 = vmatprep.mubr.bf16.mxu1 %v342_v44  ;;  %v3168_v44 = vrot.slane %v421_v38, %v433_v37 }
  0xe0   : > { %1754 = vmatpush2.bf16.msra.mxu0 %v2709_v45  ;;  %1947 = vmatpush2.bf16.msra.mxu1 %v2712_v46 }
  0xe1   : > { %1755 = vmatprep.subr.bf16.mxu0 %v2717_v60  ;;  %1948 = vmatprep.subr.bf16.mxu1 %v2720_v61 }
  0xe4   : > { %1756 = vmatpush2.bf16.msra.mxu0 %v2715_v63  ;;  %1949 = vmatpush2.bf16.msra.mxu1 %v2718_v0 }
  0xe6   : > { %876 = vmatmul.mubr.bf16.gmra.mxu0 %v341_v51  ;;  %1069 = vmatmul.mubr.bf16.gmra.mxu1 %v341_v51 }
  0xe7   : > { %885 = vmatprep.mubr.bf16.mxu0 %v344_v52  ;;  %1078 = vmatprep.mubr.bf16.mxu1 %v344_v52 }
  0xee   : > { %886 = vmatmul.mubr.bf16.gmra.mxu0 %v343_v57  ;;  %1079 = vmatmul.mubr.bf16.gmra.mxu1 %v343_v57 }
  0xef   : > { %895 = vmatprep.mubr.bf16.mxu0 %v346_v58  ;;  %1088 = vmatprep.mubr.bf16.mxu1 %v346_v58 }
  0xf6   : > { %896 = vmatmul.mubr.bf16.gmra.mxu0 %v345_v3  ;;  %1089 = vmatmul.mubr.bf16.gmra.mxu1 %v345_v3 }
  0xf7   : > { %905 = vmatprep.mubr.bf16.mxu0 %v348_v4  ;;  %1098 = vmatprep.mubr.bf16.mxu1 %v348_v4 }
  0xfe   : > { %906 = vmatmul.mubr.bf16.gmra.mxu0 %v347_v9  ;;  %1099 = vmatmul.mubr.bf16.gmra.mxu1 %v347_v9 }
  0xff   : > { %915 = vmatprep.mubr.bf16.mxu0 %v350_v10  ;;  %1108 = vmatprep.mubr.bf16.mxu1 %v350_v10 }
 0x106   : > { %916 = vmatmul.mubr.bf16.gmra.mxu0 %v349_v15  ;;  %1109 = vmatmul.mubr.bf16.gmra.mxu1 %v349_v15 }
 0x107   : > { %925 = vmatprep.mubr.bf16.mxu0 %v352_v16  ;;  %1118 = vmatprep.mubr.bf16.mxu1 %v352_v16 }
 0x10e   : > { %926 = vmatmul.mubr.bf16.gmra.mxu0 %v351_v21  ;;  %1119 = vmatmul.mubr.bf16.gmra.mxu1 %v351_v21 }
 0x10f   : > { %935 = vmatprep.mubr.bf16.mxu0 %v354_v22  ;;  %1128 = vmatprep.mubr.bf16.mxu1 %v354_v22 }
 0x116   : > { %936 = vmatmul.mubr.bf16.gmra.mxu0 %v353_v27  ;;  %1129 = vmatmul.mubr.bf16.gmra.mxu1 %v353_v27 }
 0x117   : > { %945 = vmatprep.mubr.bf16.mxu0 %v356_v28  ;;  %1138 = vmatprep.mubr.bf16.mxu1 %v356_v28 }
 0x11e   : > { %946 = vmatmul.mubr.bf16.gmra.mxu0 %v355_v31  ;;  %1139 = vmatmul.mubr.bf16.gmra.mxu1 %v355_v31 }
 0x166   : > { %v797_v39 = vpop.f32.mrf.mxu0  ;;  %v990_v40 = vpop.f32.mrf.mxu1 }
 0x167   : > { %v798_v53 = vadd.f32 %v797_v39, %v3166_v43  ;;  %v991_v54 = vadd.f32 %v990_v40, %v3168_v44 }
 0x168   : > { %v799_v45 = vpop.f32.mrf.mxu0  ;;  %v992_v46 = vpop.f32.mrf.mxu1 }
 0x169   : > { %v800_v49 = vadd.f32 %v799_v45, %v3162_v41  ;;  %v993_v50 = vadd.f32 %v992_v46, %v3164_v42  ;;  %v1149_v3 = vmax.f32 %v798_v53, 0.0  ;;  %v1151_v4 = vmax.f32 %v991_v54, 0.0 }
 0x16a   : > { %v801_v47 = vpop.f32.mrf.mxu0  ;;  %v994_v48 = vpop.f32.mrf.mxu1 }
 0x16b   : > { %v802_v51 = vadd.f32 %v801_v47, %v3166_v43  ;;  %v995_v52 = vadd.f32 %v994_v48, %v3168_v44  ;;  %v1150_v63 = vmax.f32 %v800_v49, 0.0  ;;  %v1152_v0 = vmax.f32 %v993_v50, 0.0 }
 0x16c   : > { %v803_v55 = vpop.f32.mrf.mxu0  ;;  %v996_v56 = vpop.f32.mrf.mxu1 }
 0x16d   : > { %v804_v57 = vadd.f32 %v803_v55, %v3162_v41  ;;  %v997_v58 = vadd.f32 %v996_v56, %v3164_v42  ;;  %v1153_v59 = vmax.f32 %v802_v51, 0.0  ;;  %v1155_v60 = vmax.f32 %v995_v52, 0.0 }
 0x16e   : > { %v807_v61 = vpop.f32.mrf.mxu0  ;;  %v1000_v62 = vpop.f32.mrf.mxu1 }
 0x16f   : > { %v1154_v1 = vmax.f32 %v804_v57, 0.0  ;;  %v1156_v2 = vmax.f32 %v997_v58, 0.0  ;;  %v1277_v9 = vpack.c.bf16 %v1153_v59, %v1149_v3  ;;  %v1279_v10 = vpack.c.bf16 %v1155_v60, %v1151_v4 }
 0x170   : > { %v809_v5 = vpop.f32.mrf.mxu0  ;;  %v1002_v6 = vpop.f32.mrf.mxu1  ;;  %v808_v17 = vadd.f32 %v807_v61, %v3166_v43  ;;  %v1001_v18 = vadd.f32 %v1000_v62, %v3168_v44 }
 0x171   : > { %v1278_v7 = vpack.c.bf16 %v1154_v1, %v1150_v63  ;;  %v1280_v8 = vpack.c.bf16 %v1156_v2, %v1152_v0  ;;  %v810_v11 = vadd.f32 %v809_v5, %v3162_v41  ;;  %v1003_v14 = vadd.f32 %v1002_v6, %v3164_v42 }
 0x172   : > { %v811_v12 = vpop.f32.mrf.mxu0  ;;  %v1004_v13 = vpop.f32.mrf.mxu1  ;;  %v1157_v31 = vmax.f32 %v808_v17, 0.0  ;;  %v1159_v32 = vmax.f32 %v1001_v18, 0.0 }
 0x173   : > { %v812_v15 = vadd.f32 %v811_v12, %v3166_v43  ;;  %v1005_v16 = vadd.f32 %v1004_v13, %v3168_v44  ;;  %1757 = vmatprep.mubr.bf16.mxu0 %v1278_v7  ;;  %1950 = vmatprep.mubr.bf16.mxu1 %v1280_v8  ;;  %v1158_v27 = vmax.f32 %v810_v11, 0.0  ;;  %v1160_v28 = vmax.f32 %v1003_v14, 0.0 }
 0x174   : > { %v813_v19 = vpop.f32.mrf.mxu0  ;;  %v1006_v20 = vpop.f32.mrf.mxu1  ;;  %1758 = vmatmul.mubr.bf16.vlgmr.msra.gmra.mxu0 %v1277_v9  ;;  %1951 = vmatmul.mubr.bf16.vlgmr.msra.gmra.mxu1 %v1279_v10 }
 0x175   : > { %v814_v21 = vadd.f32 %v813_v19, %v3162_v41  ;;  %v1007_v22 = vadd.f32 %v1006_v20, %v3164_v42  ;;  %v1161_v23 = vmax.f32 %v812_v15, 0.0  ;;  %v1163_v24 = vmax.f32 %v1005_v16, 0.0 }
 0x176   : > { %v817_v25 = vpop.f32.mrf.mxu0  ;;  %v1010_v26 = vpop.f32.mrf.mxu1 }
 0x177   : > { %v1162_v29 = vmax.f32 %v814_v21, 0.0  ;;  %v1164_v30 = vmax.f32 %v1007_v22, 0.0  ;;  %v1281_v37 = vpack.c.bf16 %v1161_v23, %v1157_v31  ;;  %v1283_v38 = vpack.c.bf16 %v1163_v24, %v1159_v32 }
 0x178   : > { %v819_v33 = vpop.f32.mrf.mxu0  ;;  %v1012_v34 = vpop.f32.mrf.mxu1  ;;  %v818_v49 = vadd.f32 %v817_v25, %v3166_v43  ;;  %v1011_v50 = vadd.f32 %v1010_v26, %v3168_v44 }
 0x179   : > { %v1282_v35 = vpack.c.bf16 %v1162_v29, %v1158_v27  ;;  %v1284_v36 = vpack.c.bf16 %v1164_v30, %v1160_v28  ;;  %v820_v39 = vadd.f32 %v819_v33, %v3162_v41  ;;  %v1013_v46 = vadd.f32 %v1012_v34, %v3164_v42 }
 0x17a   : > { %v821_v40 = vpop.f32.mrf.mxu0  ;;  %v1014_v45 = vpop.f32.mrf.mxu1  ;;  %v1165_v63 = vmax.f32 %v818_v49, 0.0  ;;  %v1167_v0 = vmax.f32 %v1011_v50, 0.0 }
 0x17b   : > { %v822_v47 = vadd.f32 %v821_v40, %v3166_v43  ;;  %v1015_v48 = vadd.f32 %v1014_v45, %v3168_v44  ;;  %1767 = vmatprep.mubr.bf16.mxu0 %v1282_v35  ;;  %1960 = vmatprep.mubr.bf16.mxu1 %v1284_v36  ;;  %v1166_v59 = vmax.f32 %v820_v39, 0.0  ;;  %v1168_v60 = vmax.f32 %v1013_v46, 0.0 }
 0x17c   : > { %v823_v51 = vpop.f32.mrf.mxu0  ;;  %v1016_v52 = vpop.f32.mrf.mxu1  ;;  %1768 = vmatmul.mubr.bf16.gmra.mxu0 %v1281_v37  ;;  %1961 = vmatmul.mubr.bf16.gmra.mxu1 %v1283_v38 }
 0x17d   : > { %v824_v53 = vadd.f32 %v823_v51, %v3162_v41  ;;  %v1017_v54 = vadd.f32 %v1016_v52, %v3164_v42  ;;  %v1169_v55 = vmax.f32 %v822_v47, 0.0  ;;  %v1171_v56 = vmax.f32 %v1015_v48, 0.0 }
 0x17e   : > { %v827_v57 = vpop.f32.mrf.mxu0  ;;  %v1020_v58 = vpop.f32.mrf.mxu1 }
 0x17f   : > { %v1170_v61 = vmax.f32 %v824_v53, 0.0  ;;  %v1172_v62 = vmax.f32 %v1017_v54, 0.0  ;;  %v1285_v5 = vpack.c.bf16 %v1169_v55, %v1165_v63  ;;  %v1287_v6 = vpack.c.bf16 %v1171_v56, %v1167_v0 }
 0x180   : > { %v829_v1 = vpop.f32.mrf.mxu0  ;;  %v1022_v2 = vpop.f32.mrf.mxu1  ;;  %v828_v13 = vadd.f32 %v827_v57, %v3166_v43  ;;  %v1021_v14 = vadd.f32 %v1020_v58, %v3168_v44 }
 0x181   : > { %v1286_v3 = vpack.c.bf16 %v1170_v61, %v1166_v59  ;;  %v1288_v4 = vpack.c.bf16 %v1172_v62, %v1168_v60  ;;  %v830_v7 = vadd.f32 %v829_v1, %v3162_v41  ;;  %v1023_v10 = vadd.f32 %v1022_v2, %v3164_v42 }
 0x182   : > { %v831_v8 = vpop.f32.mrf.mxu0  ;;  %v1024_v9 = vpop.f32.mrf.mxu1  ;;  %v1173_v27 = vmax.f32 %v828_v13, 0.0  ;;  %v1175_v28 = vmax.f32 %v1021_v14, 0.0 }
 0x183   : > { %v832_v11 = vadd.f32 %v831_v8, %v3166_v43  ;;  %v1025_v12 = vadd.f32 %v1024_v9, %v3168_v44  ;;  %1777 = vmatprep.mubr.bf16.mxu0 %v1286_v3  ;;  %1970 = vmatprep.mubr.bf16.mxu1 %v1288_v4  ;;  %v1174_v23 = vmax.f32 %v830_v7, 0.0  ;;  %v1176_v24 = vmax.f32 %v1023_v10, 0.0 }
 0x184   : > { %v833_v15 = vpop.f32.mrf.mxu0  ;;  %v1026_v16 = vpop.f32.mrf.mxu1  ;;  %1778 = vmatmul.mubr.bf16.gmra.mxu0 %v1285_v5  ;;  %1971 = vmatmul.mubr.bf16.gmra.mxu1 %v1287_v6 }
 0x185   : > { %v834_v17 = vadd.f32 %v833_v15, %v3162_v41  ;;  %v1027_v18 = vadd.f32 %v1026_v16, %v3164_v42  ;;  %v1177_v19 = vmax.f32 %v832_v11, 0.0  ;;  %v1179_v20 = vmax.f32 %v1025_v12, 0.0 }
 0x186   : > { %v837_v21 = vpop.f32.mrf.mxu0  ;;  %v1030_v22 = vpop.f32.mrf.mxu1 }
 0x187   : > { %v1178_v25 = vmax.f32 %v834_v17, 0.0  ;;  %v1180_v26 = vmax.f32 %v1027_v18, 0.0  ;;  %v1289_v33 = vpack.c.bf16 %v1177_v19, %v1173_v27  ;;  %v1291_v34 = vpack.c.bf16 %v1179_v20, %v1175_v28 }
 0x188   : > { %v839_v29 = vpop.f32.mrf.mxu0  ;;  %v1032_v30 = vpop.f32.mrf.mxu1  ;;  %v838_v45 = vadd.f32 %v837_v21, %v3166_v43  ;;  %v1031_v46 = vadd.f32 %v1030_v22, %v3168_v44 }
 0x189   : > { %v1290_v31 = vpack.c.bf16 %v1178_v25, %v1174_v23  ;;  %v1292_v32 = vpack.c.bf16 %v1180_v26, %v1176_v24  ;;  %v840_v35 = vadd.f32 %v839_v29, %v3162_v41  ;;  %v1033_v38 = vadd.f32 %v1032_v30, %v3164_v42 }
 0x18a   : > { %v841_v36 = vpop.f32.mrf.mxu0  ;;  %v1034_v37 = vpop.f32.mrf.mxu1  ;;  %v1181_v59 = vmax.f32 %v838_v45, 0.0  ;;  %v1183_v60 = vmax.f32 %v1031_v46, 0.0 }
 0x18b   : > { %v842_v39 = vadd.f32 %v841_v36, %v3166_v43  ;;  %v1035_v40 = vadd.f32 %v1034_v37, %v3168_v44  ;;  %1787 = vmatprep.mubr.bf16.mxu0 %v1290_v31  ;;  %1980 = vmatprep.mubr.bf16.mxu1 %v1292_v32  ;;  %v1182_v55 = vmax.f32 %v840_v35, 0.0  ;;  %v1184_v56 = vmax.f32 %v1033_v38, 0.0 }
 0x18c   : > { %v843_v47 = vpop.f32.mrf.mxu0  ;;  %v1036_v48 = vpop.f32.mrf.mxu1  ;;  %1788 = vmatmul.mubr.bf16.gmra.mxu0 %v1289_v33  ;;  %1981 = vmatmul.mubr.bf16.gmra.mxu1 %v1291_v34 }
 0x18d   : > { %v844_v49 = vadd.f32 %v843_v47, %v3162_v41  ;;  %v1037_v50 = vadd.f32 %v1036_v48, %v3164_v42  ;;  %v1185_v51 = vmax.f32 %v842_v39, 0.0  ;;  %v1187_v52 = vmax.f32 %v1035_v40, 0.0 }
 0x18e   : > { %v847_v53 = vpop.f32.mrf.mxu0  ;;  %v1040_v54 = vpop.f32.mrf.mxu1 }
 0x18f   : > { %v1186_v57 = vmax.f32 %v844_v49, 0.0  ;;  %v1188_v58 = vmax.f32 %v1037_v50, 0.0  ;;  %v1293_v1 = vpack.c.bf16 %v1185_v51, %v1181_v59  ;;  %v1295_v2 = vpack.c.bf16 %v1187_v52, %v1183_v60 }
 0x190   : > { %v849_v61 = vpop.f32.mrf.mxu0  ;;  %v1042_v62 = vpop.f32.mrf.mxu1  ;;  %v848_v9 = vadd.f32 %v847_v53, %v3166_v43  ;;  %v1041_v10 = vadd.f32 %v1040_v54, %v3168_v44 }
 0x191   : > { %v1294_v63 = vpack.c.bf16 %v1186_v57, %v1182_v55  ;;  %v1296_v0 = vpack.c.bf16 %v1188_v58, %v1184_v56  ;;  %v850_v3 = vadd.f32 %v849_v61, %v3162_v41  ;;  %v1043_v6 = vadd.f32 %v1042_v62, %v3164_v42 }
 0x192   : > { %v851_v4 = vpop.f32.mrf.mxu0  ;;  %v1044_v5 = vpop.f32.mrf.mxu1  ;;  %v1189_v23 = vmax.f32 %v848_v9, 0.0  ;;  %v1191_v24 = vmax.f32 %v1041_v10, 0.0 }
 0x193   : > { %v852_v7 = vadd.f32 %v851_v4, %v3166_v43  ;;  %v1045_v8 = vadd.f32 %v1044_v5, %v3168_v44  ;;  %1797 = vmatprep.mubr.bf16.mxu0 %v1294_v63  ;;  %1990 = vmatprep.mubr.bf16.mxu1 %v1296_v0  ;;  %v1190_v19 = vmax.f32 %v850_v3, 0.0  ;;  %v1192_v20 = vmax.f32 %v1043_v6, 0.0 }
 0x194   : > { %v853_v11 = vpop.f32.mrf.mxu0  ;;  %v1046_v12 = vpop.f32.mrf.mxu1  ;;  %1798 = vmatmul.mubr.bf16.gmra.mxu0 %v1293_v1  ;;  %1991 = vmatmul.mubr.bf16.gmra.mxu1 %v1295_v2 }
 0x195   : > { %v854_v13 = vadd.f32 %v853_v11, %v3162_v41  ;;  %v1047_v14 = vadd.f32 %v1046_v12, %v3164_v42  ;;  %v1193_v15 = vmax.f32 %v852_v7, 0.0  ;;  %v1195_v16 = vmax.f32 %v1045_v8, 0.0 }
 0x196   : > { %v857_v17 = vpop.f32.mrf.mxu0  ;;  %v1050_v18 = vpop.f32.mrf.mxu1 }
 0x197   : > { %v1194_v21 = vmax.f32 %v854_v13, 0.0  ;;  %v1196_v22 = vmax.f32 %v1047_v14, 0.0  ;;  %v1297_v29 = vpack.c.bf16 %v1193_v15, %v1189_v23  ;;  %v1299_v30 = vpack.c.bf16 %v1195_v16, %v1191_v24 }
 0x198   : > { %v859_v25 = vpop.f32.mrf.mxu0  ;;  %v1052_v26 = vpop.f32.mrf.mxu1  ;;  %v858_v37 = vadd.f32 %v857_v17, %v3166_v43  ;;  %v1051_v38 = vadd.f32 %v1050_v18, %v3168_v44 }
 0x199   : > { %v1298_v27 = vpack.c.bf16 %v1194_v21, %v1190_v19  ;;  %v1300_v28 = vpack.c.bf16 %v1196_v22, %v1192_v20  ;;  %v860_v31 = vadd.f32 %v859_v25, %v3162_v41  ;;  %v1053_v34 = vadd.f32 %v1052_v26, %v3164_v42 }
 0x19a   : > { %v861_v32 = vpop.f32.mrf.mxu0  ;;  %v1054_v33 = vpop.f32.mrf.mxu1  ;;  %v1197_v55 = vmax.f32 %v858_v37, 0.0  ;;  %v1199_v56 = vmax.f32 %v1051_v38, 0.0 }
 0x19b   : > { %v862_v35 = vadd.f32 %v861_v32, %v3166_v43  ;;  %v1055_v36 = vadd.f32 %v1054_v33, %v3168_v44  ;;  %1807 = vmatprep.mubr.bf16.mxu0 %v1298_v27  ;;  %2000 = vmatprep.mubr.bf16.mxu1 %v1300_v28  ;;  %v1198_v51 = vmax.f32 %v860_v31, 0.0  ;;  %v1200_v52 = vmax.f32 %v1053_v34, 0.0 }
 0x19c   : > { %v863_v39 = vpop.f32.mrf.mxu0  ;;  %v1056_v40 = vpop.f32.mrf.mxu1  ;;  %1808 = vmatmul.mubr.bf16.gmra.mxu0 %v1297_v29  ;;  %2001 = vmatmul.mubr.bf16.gmra.mxu1 %v1299_v30 }
 0x19d   : > { %v864_v45 = vadd.f32 %v863_v39, %v3162_v41  ;;  %v1057_v46 = vadd.f32 %v1056_v40, %v3164_v42  ;;  %v1201_v47 = vmax.f32 %v862_v35, 0.0  ;;  %v1203_v48 = vmax.f32 %v1055_v36, 0.0 }
 0x19e   : > { %v867_v49 = vpop.f32.mrf.mxu0  ;;  %v1060_v50 = vpop.f32.mrf.mxu1 }
 0x19f   : > { %v1202_v53 = vmax.f32 %v864_v45, 0.0  ;;  %v1204_v54 = vmax.f32 %v1057_v46, 0.0  ;;  %v1301_v61 = vpack.c.bf16 %v1201_v47, %v1197_v55  ;;  %v1303_v62 = vpack.c.bf16 %v1203_v48, %v1199_v56 }
 0x1a0   : > { %v869_v57 = vpop.f32.mrf.mxu0  ;;  %v1062_v58 = vpop.f32.mrf.mxu1  ;;  %v868_v5 = vadd.f32 %v867_v49, %v3166_v43  ;;  %v1061_v6 = vadd.f32 %v1060_v50, %v3168_v44 }
 0x1a1   : > { %v1302_v59 = vpack.c.bf16 %v1202_v53, %v1198_v51  ;;  %v1304_v60 = vpack.c.bf16 %v1204_v54, %v1200_v52  ;;  %v870_v63 = vadd.f32 %v869_v57, %v3162_v41  ;;  %v1063_v2 = vadd.f32 %v1062_v58, %v3164_v42 }
 0x1a2   : > { %v871_v0 = vpop.f32.mrf.mxu0  ;;  %v1064_v1 = vpop.f32.mrf.mxu1  ;;  %v1205_v19 = vmax.f32 %v868_v5, 0.0  ;;  %v1207_v20 = vmax.f32 %v1061_v6, 0.0 }
 0x1a3   : > { %v872_v3 = vadd.f32 %v871_v0, %v3166_v43  ;;  %v1065_v4 = vadd.f32 %v1064_v1, %v3168_v44  ;;  %1817 = vmatprep.mubr.bf16.mxu0 %v1302_v59  ;;  %2010 = vmatprep.mubr.bf16.mxu1 %v1304_v60  ;;  %v1206_v15 = vmax.f32 %v870_v63, 0.0  ;;  %v1208_v16 = vmax.f32 %v1063_v2, 0.0 }
 0x1a4   : > { %v873_v7 = vpop.f32.mrf.mxu0  ;;  %v1066_v8 = vpop.f32.mrf.mxu1  ;;  %1818 = vmatmul.mubr.bf16.gmra.mxu0 %v1301_v61  ;;  %2011 = vmatmul.mubr.bf16.gmra.mxu1 %v1303_v62 }
 0x1a5   : > { %v874_v9 = vadd.f32 %v873_v7, %v3162_v41  ;;  %v1067_v10 = vadd.f32 %v1066_v8, %v3164_v42  ;;  %v1209_v11 = vmax.f32 %v872_v3, 0.0  ;;  %v1211_v12 = vmax.f32 %v1065_v4, 0.0 }
 0x1a6   : > { %v877_v13 = vpop.f32.mrf.mxu0  ;;  %v1070_v14 = vpop.f32.mrf.mxu1 }
 0x1a7   : > { %v1210_v17 = vmax.f32 %v874_v9, 0.0  ;;  %v1212_v18 = vmax.f32 %v1067_v10, 0.0  ;;  %v1305_v25 = vpack.c.bf16 %v1209_v11, %v1205_v19  ;;  %v1307_v26 = vpack.c.bf16 %v1211_v12, %v1207_v20 }
 0x1a8   : > { %v879_v21 = vpop.f32.mrf.mxu0  ;;  %v1072_v22 = vpop.f32.mrf.mxu1  ;;  %v878_v33 = vadd.f32 %v877_v13, %v3166_v43  ;;  %v1071_v34 = vadd.f32 %v1070_v14, %v3168_v44 }
 0x1a9   : > { %v1306_v23 = vpack.c.bf16 %v1210_v17, %v1206_v15  ;;  %v1308_v24 = vpack.c.bf16 %v1212_v18, %v1208_v16  ;;  %v880_v27 = vadd.f32 %v879_v21, %v3162_v41  ;;  %v1073_v30 = vadd.f32 %v1072_v22, %v3164_v42 }
 0x1aa   : > { %v881_v28 = vpop.f32.mrf.mxu0  ;;  %v1074_v29 = vpop.f32.mrf.mxu1  ;;  %v1213_v51 = vmax.f32 %v878_v33, 0.0  ;;  %v1215_v52 = vmax.f32 %v1071_v34, 0.0 }
 0x1ab   : > { %v882_v31 = vadd.f32 %v881_v28, %v3166_v43  ;;  %v1075_v32 = vadd.f32 %v1074_v29, %v3168_v44  ;;  %1827 = vmatprep.mubr.bf16.mxu0 %v1306_v23  ;;  %2020 = vmatprep.mubr.bf16.mxu1 %v1308_v24  ;;  %v1214_v47 = vmax.f32 %v880_v27, 0.0  ;;  %v1216_v48 = vmax.f32 %v1073_v30, 0.0 }
 0x1ac   : > { %v883_v35 = vpop.f32.mrf.mxu0  ;;  %v1076_v36 = vpop.f32.mrf.mxu1  ;;  %1828 = vmatmul.mubr.bf16.gmra.mxu0 %v1305_v25  ;;  %2021 = vmatmul.mubr.bf16.gmra.mxu1 %v1307_v26 }
 0x1ad   : > { %v884_v37 = vadd.f32 %v883_v35, %v3162_v41  ;;  %v1077_v38 = vadd.f32 %v1076_v36, %v3164_v42  ;;  %v1217_v39 = vmax.f32 %v882_v31, 0.0  ;;  %v1219_v40 = vmax.f32 %v1075_v32, 0.0 }
 0x1ae   : > { %v887_v45 = vpop.f32.mrf.mxu0  ;;  %v1080_v46 = vpop.f32.mrf.mxu1 }
 0x1af   : > { %v1218_v49 = vmax.f32 %v884_v37, 0.0  ;;  %v1220_v50 = vmax.f32 %v1077_v38, 0.0  ;;  %v1309_v57 = vpack.c.bf16 %v1217_v39, %v1213_v51  ;;  %v1311_v58 = vpack.c.bf16 %v1219_v40, %v1215_v52 }
 0x1b0   : > { %v889_v53 = vpop.f32.mrf.mxu0  ;;  %v1082_v54 = vpop.f32.mrf.mxu1  ;;  %v888_v1 = vadd.f32 %v887_v45, %v3166_v43  ;;  %v1081_v2 = vadd.f32 %v1080_v46, %v3168_v44 }
 0x1b1   : > { %v1310_v55 = vpack.c.bf16 %v1218_v49, %v1214_v47  ;;  %v1312_v56 = vpack.c.bf16 %v1220_v50, %v1216_v48  ;;  %v890_v59 = vadd.f32 %v889_v53, %v3162_v41  ;;  %v1083_v62 = vadd.f32 %v1082_v54, %v3164_v42 }
 0x1b2   : > { %v891_v60 = vpop.f32.mrf.mxu0  ;;  %v1084_v61 = vpop.f32.mrf.mxu1  ;;  %v1221_v15 = vmax.f32 %v888_v1, 0.0  ;;  %v1223_v16 = vmax.f32 %v1081_v2, 0.0 }
 0x1b3   : > { %v892_v63 = vadd.f32 %v891_v60, %v3166_v43  ;;  %v1085_v0 = vadd.f32 %v1084_v61, %v3168_v44  ;;  %1837 = vmatprep.mubr.bf16.mxu0 %v1310_v55  ;;  %2030 = vmatprep.mubr.bf16.mxu1 %v1312_v56  ;;  %v1222_v11 = vmax.f32 %v890_v59, 0.0  ;;  %v1224_v12 = vmax.f32 %v1083_v62, 0.0 }
 0x1b4   : > { %v893_v3 = vpop.f32.mrf.mxu0  ;;  %v1086_v4 = vpop.f32.mrf.mxu1  ;;  %1838 = vmatmul.mubr.bf16.gmra.mxu0 %v1309_v57  ;;  %2031 = vmatmul.mubr.bf16.gmra.mxu1 %v1311_v58 }
 0x1b5   : > { %v894_v5 = vadd.f32 %v893_v3, %v3162_v41  ;;  %v1087_v6 = vadd.f32 %v1086_v4, %v3164_v42  ;;  %v1225_v7 = vmax.f32 %v892_v63, 0.0  ;;  %v1227_v8 = vmax.f32 %v1085_v0, 0.0 }
 0x1b6   : > { %v897_v9 = vpop.f32.mrf.mxu0  ;;  %v1090_v10 = vpop.f32.mrf.mxu1 }
 0x1b7   : > { %v1226_v13 = vmax.f32 %v894_v5, 0.0  ;;  %v1228_v14 = vmax.f32 %v1087_v6, 0.0  ;;  %v1313_v21 = vpack.c.bf16 %v1225_v7, %v1221_v15  ;;  %v1315_v22 = vpack.c.bf16 %v1227_v8, %v1223_v16 }
 0x1b8   : > { %v899_v17 = vpop.f32.mrf.mxu0  ;;  %v1092_v18 = vpop.f32.mrf.mxu1  ;;  %v898_v29 = vadd.f32 %v897_v9, %v3166_v43  ;;  %v1091_v30 = vadd.f32 %v1090_v10, %v3168_v44 }
 0x1b9   : > { %v1314_v19 = vpack.c.bf16 %v1226_v13, %v1222_v11  ;;  %v1316_v20 = vpack.c.bf16 %v1228_v14, %v1224_v12  ;;  %v900_v23 = vadd.f32 %v899_v17, %v3162_v41  ;;  %v1093_v26 = vadd.f32 %v1092_v18, %v3164_v42 }
 0x1ba   : > { %v901_v24 = vpop.f32.mrf.mxu0  ;;  %v1094_v25 = vpop.f32.mrf.mxu1  ;;  %v1229_v47 = vmax.f32 %v898_v29, 0.0  ;;  %v1231_v48 = vmax.f32 %v1091_v30, 0.0 }
 0x1bb   : > { %v902_v27 = vadd.f32 %v901_v24, %v3166_v43  ;;  %v1095_v28 = vadd.f32 %v1094_v25, %v3168_v44  ;;  %1847 = vmatprep.mubr.bf16.mxu0 %v1314_v19  ;;  %2040 = vmatprep.mubr.bf16.mxu1 %v1316_v20  ;;  %v1230_v39 = vmax.f32 %v900_v23, 0.0  ;;  %v1232_v40 = vmax.f32 %v1093_v26, 0.0 }
 0x1bc   : > { %v903_v31 = vpop.f32.mrf.mxu0  ;;  %v1096_v32 = vpop.f32.mrf.mxu1  ;;  %1848 = vmatmul.mubr.bf16.gmra.mxu0 %v1313_v21  ;;  %2041 = vmatmul.mubr.bf16.gmra.mxu1 %v1315_v22 }
 0x1bd   : > { %v904_v33 = vadd.f32 %v903_v31, %v3162_v41  ;;  %v1097_v34 = vadd.f32 %v1096_v32, %v3164_v42  ;;  %v1233_v35 = vmax.f32 %v902_v27, 0.0  ;;  %v1235_v36 = vmax.f32 %v1095_v28, 0.0 }
 0x1be   : > { %v907_v37 = vpop.f32.mrf.mxu0  ;;  %v1100_v38 = vpop.f32.mrf.mxu1 }
 0x1bf   : > { %v1234_v45 = vmax.f32 %v904_v33, 0.0  ;;  %v1236_v46 = vmax.f32 %v1097_v34, 0.0  ;;  %v1317_v53 = vpack.c.bf16 %v1233_v35, %v1229_v47  ;;  %v1319_v54 = vpack.c.bf16 %v1235_v36, %v1231_v48 }
 0x1c0   : > { %v909_v49 = vpop.f32.mrf.mxu0  ;;  %v1102_v50 = vpop.f32.mrf.mxu1  ;;  %v908_v61 = vadd.f32 %v907_v37, %v3166_v43  ;;  %v1101_v62 = vadd.f32 %v1100_v38, %v3168_v44 }
 0x1c1   : > { %v1318_v51 = vpack.c.bf16 %v1234_v45, %v1230_v39  ;;  %v1320_v52 = vpack.c.bf16 %v1236_v46, %v1232_v40  ;;  %v910_v55 = vadd.f32 %v909_v49, %v3162_v41  ;;  %v1103_v58 = vadd.f32 %v1102_v50, %v3164_v42 }
 0x1c2   : > { %v911_v56 = vpop.f32.mrf.mxu0  ;;  %v1104_v57 = vpop.f32.mrf.mxu1  ;;  %v1237_v11 = vmax.f32 %v908_v61, 0.0  ;;  %v1239_v12 = vmax.f32 %v1101_v62, 0.0 }
 0x1c3   : > { %v912_v59 = vadd.f32 %v911_v56, %v3166_v43  ;;  %v1105_v60 = vadd.f32 %v1104_v57, %v3168_v44  ;;  %1857 = vmatprep.mubr.bf16.mxu0 %v1318_v51  ;;  %2050 = vmatprep.mubr.bf16.mxu1 %v1320_v52  ;;  %v1238_v7 = vmax.f32 %v910_v55, 0.0  ;;  %v1240_v8 = vmax.f32 %v1103_v58, 0.0 }
 0x1c4   : > { %v913_v63 = vpop.f32.mrf.mxu0  ;;  %v1106_v0 = vpop.f32.mrf.mxu1  ;;  %1858 = vmatmul.mubr.bf16.gmra.mxu0 %v1317_v53  ;;  %2051 = vmatmul.mubr.bf16.gmra.mxu1 %v1319_v54 }
 0x1c5   : > { %v914_v1 = vadd.f32 %v913_v63, %v3162_v41  ;;  %v1107_v2 = vadd.f32 %v1106_v0, %v3164_v42  ;;  %v1241_v3 = vmax.f32 %v912_v59, 0.0  ;;  %v1243_v4 = vmax.f32 %v1105_v60, 0.0 }
 0x1c6   : > { %v917_v5 = vpop.f32.mrf.mxu0  ;;  %v1110_v6 = vpop.f32.mrf.mxu1 }
 0x1c7   : > { %v1242_v9 = vmax.f32 %v914_v1, 0.0  ;;  %v1244_v10 = vmax.f32 %v1107_v2, 0.0  ;;  %v1321_v17 = vpack.c.bf16 %v1241_v3, %v1237_v11  ;;  %v1323_v18 = vpack.c.bf16 %v1243_v4, %v1239_v12 }
 0x1c8   : > { %v919_v13 = vpop.f32.mrf.mxu0  ;;  %v1112_v14 = vpop.f32.mrf.mxu1  ;;  %v918_v25 = vadd.f32 %v917_v5, %v3166_v43  ;;  %v1111_v26 = vadd.f32 %v1110_v6, %v3168_v44 }
 0x1c9   : > { %v1322_v15 = vpack.c.bf16 %v1242_v9, %v1238_v7  ;;  %v1324_v16 = vpack.c.bf16 %v1244_v10, %v1240_v8  ;;  %v920_v19 = vadd.f32 %v919_v13, %v3162_v41  ;;  %v1113_v22 = vadd.f32 %v1112_v14, %v3164_v42 }
 0x1ca   : > { %v921_v20 = vpop.f32.mrf.mxu0  ;;  %v1114_v21 = vpop.f32.mrf.mxu1  ;;  %v1245_v39 = vmax.f32 %v918_v25, 0.0  ;;  %v1247_v40 = vmax.f32 %v1111_v26, 0.0 }
 0x1cb   : > { %v922_v23 = vadd.f32 %v921_v20, %v3166_v43  ;;  %v1115_v24 = vadd.f32 %v1114_v21, %v3168_v44  ;;  %1867 = vmatprep.mubr.bf16.mxu0 %v1322_v15  ;;  %2060 = vmatprep.mubr.bf16.mxu1 %v1324_v16  ;;  %v1246_v35 = vmax.f32 %v920_v19, 0.0  ;;  %v1248_v36 = vmax.f32 %v1113_v22, 0.0 }
 0x1cc   : > { %v923_v27 = vpop.f32.mrf.mxu0  ;;  %v1116_v28 = vpop.f32.mrf.mxu1  ;;  %1868 = vmatmul.mubr.bf16.gmra.mxu0 %v1321_v17  ;;  %2061 = vmatmul.mubr.bf16.gmra.mxu1 %v1323_v18 }
 0x1cd   : > { %v924_v29 = vadd.f32 %v923_v27, %v3162_v41  ;;  %v1117_v30 = vadd.f32 %v1116_v28, %v3164_v42  ;;  %v1249_v31 = vmax.f32 %v922_v23, 0.0  ;;  %v1251_v32 = vmax.f32 %v1115_v24, 0.0 }
 0x1ce   : > { %v927_v33 = vpop.f32.mrf.mxu0  ;;  %v1120_v34 = vpop.f32.mrf.mxu1 }
 0x1cf   : > { %v1250_v37 = vmax.f32 %v924_v29, 0.0  ;;  %v1252_v38 = vmax.f32 %v1117_v30, 0.0  ;;  %v1325_v49 = vpack.c.bf16 %v1249_v31, %v1245_v39  ;;  %v1327_v50 = vpack.c.bf16 %v1251_v32, %v1247_v40 }
 0x1d0   : > { %v929_v45 = vpop.f32.mrf.mxu0  ;;  %v1122_v46 = vpop.f32.mrf.mxu1  ;;  %v928_v57 = vadd.f32 %v927_v33, %v3166_v43  ;;  %v1121_v58 = vadd.f32 %v1120_v34, %v3168_v44 }
 0x1d1   : > { %v1326_v47 = vpack.c.bf16 %v1250_v37, %v1246_v35  ;;  %v1328_v48 = vpack.c.bf16 %v1252_v38, %v1248_v36  ;;  %v930_v51 = vadd.f32 %v929_v45, %v3162_v41  ;;  %v1123_v54 = vadd.f32 %v1122_v46, %v3164_v42 }
 0x1d2   : > { %v931_v52 = vpop.f32.mrf.mxu0  ;;  %v1124_v53 = vpop.f32.mrf.mxu1  ;;  %v1253_v7 = vmax.f32 %v928_v57, 0.0  ;;  %v1255_v8 = vmax.f32 %v1121_v58, 0.0 }
 0x1d3   : > { %v932_v55 = vadd.f32 %v931_v52, %v3166_v43  ;;  %v1125_v56 = vadd.f32 %v1124_v53, %v3168_v44  ;;  %1877 = vmatprep.mubr.bf16.mxu0 %v1326_v47  ;;  %2070 = vmatprep.mubr.bf16.mxu1 %v1328_v48  ;;  %v1254_v3 = vmax.f32 %v930_v51, 0.0  ;;  %v1256_v4 = vmax.f32 %v1123_v54, 0.0 }
 0x1d4   : > { %v933_v59 = vpop.f32.mrf.mxu0  ;;  %v1126_v60 = vpop.f32.mrf.mxu1  ;;  %1878 = vmatmul.mubr.bf16.gmra.mxu0 %v1325_v49  ;;  %2071 = vmatmul.mubr.bf16.gmra.mxu1 %v1327_v50 }
 0x1d5   : > { %v934_v61 = vadd.f32 %v933_v59, %v3162_v41  ;;  %v1127_v62 = vadd.f32 %v1126_v60, %v3164_v42  ;;  %v1257_v63 = vmax.f32 %v932_v55, 0.0  ;;  %v1259_v0 = vmax.f32 %v1125_v56, 0.0 }
 0x1d6   : > { %v937_v1 = vpop.f32.mrf.mxu0  ;;  %v1130_v2 = vpop.f32.mrf.mxu1 }
 0x1d7   : > { %v1258_v5 = vmax.f32 %v934_v61, 0.0  ;;  %v1260_v6 = vmax.f32 %v1127_v62, 0.0  ;;  %v1329_v13 = vpack.c.bf16 %v1257_v63, %v1253_v7  ;;  %v1331_v14 = vpack.c.bf16 %v1259_v0, %v1255_v8 }
 0x1d8   : > { %v939_v9 = vpop.f32.mrf.mxu0  ;;  %v1132_v10 = vpop.f32.mrf.mxu1  ;;  %v938_v21 = vadd.f32 %v937_v1, %v3166_v43  ;;  %v1131_v22 = vadd.f32 %v1130_v2, %v3168_v44 }
 0x1d9   : > { %v1330_v11 = vpack.c.bf16 %v1258_v5, %v1254_v3  ;;  %v1332_v12 = vpack.c.bf16 %v1260_v6, %v1256_v4  ;;  %v940_v15 = vadd.f32 %v939_v9, %v3162_v41  ;;  %v1133_v18 = vadd.f32 %v1132_v10, %v3164_v42 }
 0x1da   : > { %v941_v16 = vpop.f32.mrf.mxu0  ;;  %v1134_v17 = vpop.f32.mrf.mxu1  ;;  %v1261_v35 = vmax.f32 %v938_v21, 0.0  ;;  %v1263_v36 = vmax.f32 %v1131_v22, 0.0 }
 0x1db   : > { %v942_v19 = vadd.f32 %v941_v16, %v3166_v43  ;;  %v1135_v20 = vadd.f32 %v1134_v17, %v3168_v44  ;;  %1887 = vmatprep.mubr.bf16.mxu0 %v1330_v11  ;;  %2080 = vmatprep.mubr.bf16.mxu1 %v1332_v12  ;;  %v1262_v31 = vmax.f32 %v940_v15, 0.0  ;;  %v1264_v32 = vmax.f32 %v1133_v18, 0.0 }
 0x1dc   : > { %v943_v23 = vpop.f32.mrf.mxu0  ;;  %v1136_v24 = vpop.f32.mrf.mxu1  ;;  %1888 = vmatmul.mubr.bf16.gmra.mxu0 %v1329_v13  ;;  %2081 = vmatmul.mubr.bf16.gmra.mxu1 %v1331_v14 }
 0x1dd   : > { %v944_v25 = vadd.f32 %v943_v23, %v3162_v41  ;;  %v1137_v26 = vadd.f32 %v1136_v24, %v3164_v42  ;;  %v1265_v27 = vmax.f32 %v942_v19, 0.0  ;;  %v1267_v28 = vmax.f32 %v1135_v20, 0.0 }
 0x1de   : > { %v947_v29 = vpop.f32.mrf.mxu0  ;;  %v1140_v30 = vpop.f32.mrf.mxu1 }
 0x1df   : > { %v1266_v33 = vmax.f32 %v944_v25, 0.0  ;;  %v1268_v34 = vmax.f32 %v1137_v26, 0.0  ;;  %v1333_v45 = vpack.c.bf16 %v1265_v27, %v1261_v35  ;;  %v1335_v46 = vpack.c.bf16 %v1267_v28, %v1263_v36 }
 0x1e0   : > { %v949_v37 = vpop.f32.mrf.mxu0  ;;  %v1142_v38 = vpop.f32.mrf.mxu1  ;;  %v948_v53 = vadd.f32 %v947_v29, %v3166_v43  ;;  %v1141_v54 = vadd.f32 %v1140_v30, %v3168_v44 }
 0x1e1   : > { %v1334_v39 = vpack.c.bf16 %v1266_v33, %v1262_v31  ;;  %v1336_v40 = vpack.c.bf16 %v1268_v34, %v1264_v32  ;;  %v950_v47 = vadd.f32 %v949_v37, %v3162_v41  ;;  %v1143_v50 = vadd.f32 %v1142_v38, %v3164_v42 }
 0x1e2   : > { %v951_v48 = vpop.f32.mrf.mxu0  ;;  %v1144_v49 = vpop.f32.mrf.mxu1  ;;  %v1269_v1 = vmax.f32 %v948_v53, 0.0  ;;  %v1271_v2 = vmax.f32 %v1141_v54, 0.0 }
 0x1e3   : > { %v952_v51 = vadd.f32 %v951_v48, %v3166_v43  ;;  %v1145_v52 = vadd.f32 %v1144_v49, %v3168_v44  ;;  %1897 = vmatprep.mubr.bf16.mxu0 %v1334_v39  ;;  %2090 = vmatprep.mubr.bf16.mxu1 %v1336_v40  ;;  %v1270_v61 = vmax.f32 %v950_v47, 0.0  ;;  %v1272_v62 = vmax.f32 %v1143_v50, 0.0 }
 0x1e4   : > { %v953_v55 = vpop.f32.mrf.mxu0  ;;  %v1146_v56 = vpop.f32.mrf.mxu1  ;;  %1898 = vmatmul.mubr.bf16.gmra.mxu0 %v1333_v45  ;;  %2091 = vmatmul.mubr.bf16.gmra.mxu1 %v1335_v46 }
 0x1e5   : > { %v954_v57 = vadd.f32 %v953_v55, %v3162_v41  ;;  %v1147_v58 = vadd.f32 %v1146_v56, %v3164_v42  ;;  %v1273_v59 = vmax.f32 %v952_v51, 0.0  ;;  %v1275_v60 = vmax.f32 %v1145_v52, 0.0 }
 0x1e7   : > { %v1274_v63 = vmax.f32 %v954_v57, 0.0  ;;  %v1276_v0 = vmax.f32 %v1147_v58, 0.0  ;;  %v1337_v44 = vpack.c.bf16 %v1273_v59, %v1269_v1  ;;  %v1339_v4 = vpack.c.bf16 %v1275_v60, %v1271_v2 }
 0x1e9   : > { %v1338_v43 = vpack.c.bf16 %v1274_v63, %v1270_v61  ;;  %v1340_v3 = vpack.c.bf16 %v1276_v0, %v1272_v62 }
 0x1eb   : > { %1907 = vmatprep.mubr.bf16.mxu0 %v1338_v43  ;;  %2100 = vmatprep.mubr.bf16.mxu1 %v1340_v3 }
 0x1ec   : > { %1908 = vmatmul.mubr.bf16.gmra.mxu0 %v1337_v44  ;;  %2101 = vmatmul.mubr.bf16.gmra.mxu1 %v1339_v4 }
 0x234   : > { %v1759_v41 = vpop.f32.mrf.mxu0  ;;  %v1952_v5 = vpop.f32.mrf.mxu1 }
 0x235   : > { %v1953_v42 = vadd.f32 %v1952_v5, %v1759_v41 }
 0x236   : > { %v1761_v6 = vpop.f32.mrf.mxu0  ;;  %v1954_v7 = vpop.f32.mrf.mxu1 }
 0x237   : > { %2111 = vst [vmem:[%s3300_s21] sm:$0xff] %v1953_v42  ;;  %v1955_v8 = vadd.f32 %v1954_v7, %v1761_v6 }
 0x238   : > { %v1763_v9 = vpop.f32.mrf.mxu0  ;;  %v1956_v10 = vpop.f32.mrf.mxu1 }
 0x239   : > { %2112 = vst [vmem:[%s3300_s21 + $0x8] sm:$0xff] %v1955_v8  ;;  %v1957_v11 = vadd.f32 %v1956_v10, %v1763_v9 }
 0x23a   : > { %v1765_v12 = vpop.f32.mrf.mxu0  ;;  %v1958_v13 = vpop.f32.mrf.mxu1 }
 0x23b   : > { %2113 = vst [vmem:[%s3300_s21 + $0x10] sm:$0xff] %v1957_v11  ;;  %v1959_v14 = vadd.f32 %v1958_v13, %v1765_v12 }
 0x23c   : > { %v1769_v15 = vpop.f32.mrf.mxu0  ;;  %v1962_v16 = vpop.f32.mrf.mxu1 }
 0x23d   : > { %2114 = vst [vmem:[%s3300_s21 + $0x18] sm:$0xff] %v1959_v14  ;;  %v1963_v17 = vadd.f32 %v1962_v16, %v1769_v15 }
 0x23e   : > { %v1771_v18 = vpop.f32.mrf.mxu0  ;;  %v1964_v19 = vpop.f32.mrf.mxu1 }
 0x23f   : > { %2115 = vst [vmem:[%s3300_s21 + $0x20] sm:$0xff] %v1963_v17  ;;  %v1965_v20 = vadd.f32 %v1964_v19, %v1771_v18 }
 0x240   : > { %v1773_v21 = vpop.f32.mrf.mxu0  ;;  %v1966_v22 = vpop.f32.mrf.mxu1 }
 0x241   : > { %2116 = vst [vmem:[%s3300_s21 + $0x28] sm:$0xff] %v1965_v20  ;;  %v1967_v23 = vadd.f32 %v1966_v22, %v1773_v21 }
 0x242   : > { %v1775_v24 = vpop.f32.mrf.mxu0  ;;  %v1968_v25 = vpop.f32.mrf.mxu1 }
 0x243   : > { %2117 = vst [vmem:[%s3300_s21 + $0x30] sm:$0xff] %v1967_v23  ;;  %v1969_v26 = vadd.f32 %v1968_v25, %v1775_v24 }
 0x244   : > { %v1779_v27 = vpop.f32.mrf.mxu0  ;;  %v1972_v28 = vpop.f32.mrf.mxu1 }
 0x245   : > { %2118 = vst [vmem:[%s3300_s21 + $0x38] sm:$0xff] %v1969_v26  ;;  %v1973_v29 = vadd.f32 %v1972_v28, %v1779_v27 }
 0x246   : > { %v1781_v30 = vpop.f32.mrf.mxu0  ;;  %v1974_v31 = vpop.f32.mrf.mxu1 }
 0x247   : > { %2119 = vst [vmem:[%s3300_s21 + $0x40] sm:$0xff] %v1973_v29  ;;  %v1975_v32 = vadd.f32 %v1974_v31, %v1781_v30 }
 0x248   : > { %v1783_v33 = vpop.f32.mrf.mxu0  ;;  %v1976_v34 = vpop.f32.mrf.mxu1 }
 0x249   : > { %2120 = vst [vmem:[%s3300_s21 + $0x48] sm:$0xff] %v1975_v32  ;;  %v1977_v35 = vadd.f32 %v1976_v34, %v1783_v33 }
 0x24a   : > { %v1785_v36 = vpop.f32.mrf.mxu0  ;;  %v1978_v37 = vpop.f32.mrf.mxu1 }
 0x24b   : > { %2121 = vst [vmem:[%s3300_s21 + $0x50] sm:$0xff] %v1977_v35  ;;  %v1979_v38 = vadd.f32 %v1978_v37, %v1785_v36 }
 0x24c   : > { %v1789_v39 = vpop.f32.mrf.mxu0  ;;  %v1982_v40 = vpop.f32.mrf.mxu1 }
 0x24d   : > { %2122 = vst [vmem:[%s3300_s21 + $0x58] sm:$0xff] %v1979_v38  ;;  %v1983_v45 = vadd.f32 %v1982_v40, %v1789_v39 }
 0x24e   : > { %v1791_v46 = vpop.f32.mrf.mxu0  ;;  %v1984_v47 = vpop.f32.mrf.mxu1 }
 0x24f   : > { %2123 = vst [vmem:[%s3300_s21 + $0x60] sm:$0xff] %v1983_v45  ;;  %v1985_v48 = vadd.f32 %v1984_v47, %v1791_v46 }
 0x250   : > { %v1793_v49 = vpop.f32.mrf.mxu0  ;;  %v1986_v50 = vpop.f32.mrf.mxu1 }
 0x251   : > { %2124 = vst [vmem:[%s3300_s21 + $0x68] sm:$0xff] %v1985_v48  ;;  %v1987_v51 = vadd.f32 %v1986_v50, %v1793_v49 }
 0x252   : > { %v1795_v52 = vpop.f32.mrf.mxu0  ;;  %v1988_v53 = vpop.f32.mrf.mxu1 }
 0x253   : > { %2125 = vst [vmem:[%s3300_s21 + $0x70] sm:$0xff] %v1987_v51  ;;  %v1989_v54 = vadd.f32 %v1988_v53, %v1795_v52 }
 0x254   : > { %v1799_v55 = vpop.f32.mrf.mxu0  ;;  %v1992_v56 = vpop.f32.mrf.mxu1 }
 0x255   : > { %2126 = vst [vmem:[%s3300_s21 + $0x78] sm:$0xff] %v1989_v54  ;;  %v1993_v57 = vadd.f32 %v1992_v56, %v1799_v55 }
 0x256   : > { %v1801_v58 = vpop.f32.mrf.mxu0  ;;  %v1994_v59 = vpop.f32.mrf.mxu1 }
 0x257   : > { %2127 = vst [vmem:[%s3300_s21 + $0x80] sm:$0xff] %v1993_v57  ;;  %v1995_v60 = vadd.f32 %v1994_v59, %v1801_v58 }
 0x258   : > { %v1803_v61 = vpop.f32.mrf.mxu0  ;;  %v1996_v62 = vpop.f32.mrf.mxu1 }
 0x259   : > { %2128 = vst [vmem:[%s3300_s21 + $0x88] sm:$0xff] %v1995_v60  ;;  %v1997_v63 = vadd.f32 %v1996_v62, %v1803_v61 }
 0x25a   : > { %v1805_v0 = vpop.f32.mrf.mxu0  ;;  %v1998_v1 = vpop.f32.mrf.mxu1 }
 0x25b   : > { %2129 = vst [vmem:[%s3300_s21 + $0x90] sm:$0xff] %v1997_v63  ;;  %v1999_v2 = vadd.f32 %v1998_v1, %v1805_v0 }
 0x25c   : > { %v1809_v43 = vpop.f32.mrf.mxu0  ;;  %v2002_v3 = vpop.f32.mrf.mxu1 }
 0x25d   : > { %2130 = vst [vmem:[%s3300_s21 + $0x98] sm:$0xff] %v1999_v2  ;;  %v2003_v44 = vadd.f32 %v2002_v3, %v1809_v43 }
 0x25e   : > { %v1811_v4 = vpop.f32.mrf.mxu0  ;;  %v2004_v41 = vpop.f32.mrf.mxu1 }
 0x25f   : > { %2131 = vst [vmem:[%s3300_s21 + $0xa0] sm:$0xff] %v2003_v44  ;;  %v2005_v5 = vadd.f32 %v2004_v41, %v1811_v4 }
 0x260   : > { %v1813_v42 = vpop.f32.mrf.mxu0  ;;  %v2006_v6 = vpop.f32.mrf.mxu1 }
 0x261   : > { %2132 = vst [vmem:[%s3300_s21 + $0xa8] sm:$0xff] %v2005_v5  ;;  %v2007_v7 = vadd.f32 %v2006_v6, %v1813_v42 }
 0x262   : > { %v1815_v8 = vpop.f32.mrf.mxu0  ;;  %v2008_v9 = vpop.f32.mrf.mxu1 }
 0x263   : > { %2133 = vst [vmem:[%s3300_s21 + $0xb0] sm:$0xff] %v2007_v7  ;;  %v2009_v10 = vadd.f32 %v2008_v9, %v1815_v8 }
 0x264   : > { %v1819_v11 = vpop.f32.mrf.mxu0  ;;  %v2012_v12 = vpop.f32.mrf.mxu1 }
 0x265   : > { %2134 = vst [vmem:[%s3300_s21 + $0xb8] sm:$0xff] %v2009_v10  ;;  %v2013_v13 = vadd.f32 %v2012_v12, %v1819_v11 }
 0x266   : > { %v1821_v14 = vpop.f32.mrf.mxu0  ;;  %v2014_v15 = vpop.f32.mrf.mxu1 }
 0x267   : > { %2135 = vst [vmem:[%s3300_s21 + $0xc0] sm:$0xff] %v2013_v13  ;;  %v2015_v16 = vadd.f32 %v2014_v15, %v1821_v14 }
 0x268   : > { %v1823_v17 = vpop.f32.mrf.mxu0  ;;  %v2016_v18 = vpop.f32.mrf.mxu1 }
 0x269   : > { %2136 = vst [vmem:[%s3300_s21 + $0xc8] sm:$0xff] %v2015_v16  ;;  %v2017_v19 = vadd.f32 %v2016_v18, %v1823_v17 }
 0x26a   : > { %v1825_v20 = vpop.f32.mrf.mxu0  ;;  %v2018_v21 = vpop.f32.mrf.mxu1 }
 0x26b   : > { %2137 = vst [vmem:[%s3300_s21 + $0xd0] sm:$0xff] %v2017_v19  ;;  %v2019_v22 = vadd.f32 %v2018_v21, %v1825_v20 }
 0x26c   : > { %v1829_v23 = vpop.f32.mrf.mxu0  ;;  %v2022_v24 = vpop.f32.mrf.mxu1 }
 0x26d   : > { %2138 = vst [vmem:[%s3300_s21 + $0xd8] sm:$0xff] %v2019_v22  ;;  %v2023_v25 = vadd.f32 %v2022_v24, %v1829_v23 }
 0x26e   : > { %v1831_v26 = vpop.f32.mrf.mxu0  ;;  %v2024_v27 = vpop.f32.mrf.mxu1 }
 0x26f   : > { %2139 = vst [vmem:[%s3300_s21 + $0xe0] sm:$0xff] %v2023_v25  ;;  %v2025_v28 = vadd.f32 %v2024_v27, %v1831_v26 }
 0x270   : > { %v1833_v29 = vpop.f32.mrf.mxu0  ;;  %v2026_v30 = vpop.f32.mrf.mxu1 }
 0x271   : > { %2140 = vst [vmem:[%s3300_s21 + $0xe8] sm:$0xff] %v2025_v28  ;;  %v2027_v31 = vadd.f32 %v2026_v30, %v1833_v29 }
 0x272   : > { %v1835_v32 = vpop.f32.mrf.mxu0  ;;  %v2028_v33 = vpop.f32.mrf.mxu1 }
 0x273   : > { %2141 = vst [vmem:[%s3300_s21 + $0xf0] sm:$0xff] %v2027_v31  ;;  %v2029_v34 = vadd.f32 %v2028_v33, %v1835_v32 }
 0x274   : > { %v1839_v35 = vpop.f32.mrf.mxu0  ;;  %v2032_v36 = vpop.f32.mrf.mxu1 }
 0x275   : > { %2142 = vst [vmem:[%s3300_s21 + $0xf8] sm:$0xff] %v2029_v34  ;;  %v2033_v37 = vadd.f32 %v2032_v36, %v1839_v35 }
 0x276   : > { %v1841_v38 = vpop.f32.mrf.mxu0  ;;  %v2034_v39 = vpop.f32.mrf.mxu1 }
 0x277   : > { %2143 = vst [vmem:[%s3300_s21 + $0x100] sm:$0xff] %v2033_v37  ;;  %v2035_v40 = vadd.f32 %v2034_v39, %v1841_v38 }
 0x278   : > { %v1843_v45 = vpop.f32.mrf.mxu0  ;;  %v2036_v46 = vpop.f32.mrf.mxu1 }
 0x279   : > { %2144 = vst [vmem:[%s3300_s21 + $0x108] sm:$0xff] %v2035_v40  ;;  %v2037_v47 = vadd.f32 %v2036_v46, %v1843_v45 }
 0x27a   : > { %v1845_v48 = vpop.f32.mrf.mxu0  ;;  %v2038_v49 = vpop.f32.mrf.mxu1 }
 0x27b   : > { %2145 = vst [vmem:[%s3300_s21 + $0x110] sm:$0xff] %v2037_v47  ;;  %v2039_v50 = vadd.f32 %v2038_v49, %v1845_v48 }
 0x27c   : > { %v1849_v51 = vpop.f32.mrf.mxu0  ;;  %v2042_v52 = vpop.f32.mrf.mxu1 }
 0x27d   : > { %2146 = vst [vmem:[%s3300_s21 + $0x118] sm:$0xff] %v2039_v50  ;;  %v2043_v53 = vadd.f32 %v2042_v52, %v1849_v51 }
 0x27e   : > { %v1851_v54 = vpop.f32.mrf.mxu0  ;;  %v2044_v55 = vpop.f32.mrf.mxu1 }
 0x27f   : > { %2147 = vst [vmem:[%s3300_s21 + $0x120] sm:$0xff] %v2043_v53  ;;  %v2045_v56 = vadd.f32 %v2044_v55, %v1851_v54 }
 0x280   : > { %v1853_v57 = vpop.f32.mrf.mxu0  ;;  %v2046_v58 = vpop.f32.mrf.mxu1 }
 0x281   : > { %2148 = vst [vmem:[%s3300_s21 + $0x128] sm:$0xff] %v2045_v56  ;;  %v2047_v59 = vadd.f32 %v2046_v58, %v1853_v57 }
 0x282   : > { %v1855_v60 = vpop.f32.mrf.mxu0  ;;  %v2048_v61 = vpop.f32.mrf.mxu1 }
 0x283   : > { %2149 = vst [vmem:[%s3300_s21 + $0x130] sm:$0xff] %v2047_v59  ;;  %v2049_v62 = vadd.f32 %v2048_v61, %v1855_v60 }
 0x284   : > { %v1859_v63 = vpop.f32.mrf.mxu0  ;;  %v2052_v0 = vpop.f32.mrf.mxu1 }
 0x285   : > { %2150 = vst [vmem:[%s3300_s21 + $0x138] sm:$0xff] %v2049_v62  ;;  %v2053_v1 = vadd.f32 %v2052_v0, %v1859_v63 }
 0x286   : > { %v1861_v2 = vpop.f32.mrf.mxu0  ;;  %v2054_v43 = vpop.f32.mrf.mxu1 }
 0x287   : > { %2151 = vst [vmem:[%s3300_s21 + $0x140] sm:$0xff] %v2053_v1  ;;  %v2055_v3 = vadd.f32 %v2054_v43, %v1861_v2 }
 0x288   : > { %v1863_v44 = vpop.f32.mrf.mxu0  ;;  %v2056_v4 = vpop.f32.mrf.mxu1 }
 0x289   : > { %2152 = vst [vmem:[%s3300_s21 + $0x148] sm:$0xff] %v2055_v3  ;;  %v2057_v41 = vadd.f32 %v2056_v4, %v1863_v44 }
 0x28a   : > { %v1865_v5 = vpop.f32.mrf.mxu0  ;;  %v2058_v42 = vpop.f32.mrf.mxu1 }
 0x28b   : > { %2153 = vst [vmem:[%s3300_s21 + $0x150] sm:$0xff] %v2057_v41  ;;  %v2059_v6 = vadd.f32 %v2058_v42, %v1865_v5 }
 0x28c   : > { %v1869_v7 = vpop.f32.mrf.mxu0  ;;  %v2062_v8 = vpop.f32.mrf.mxu1 }
 0x28d   : > { %2154 = vst [vmem:[%s3300_s21 + $0x158] sm:$0xff] %v2059_v6  ;;  %v2063_v9 = vadd.f32 %v2062_v8, %v1869_v7 }
 0x28e   : > { %v1871_v10 = vpop.f32.mrf.mxu0  ;;  %v2064_v11 = vpop.f32.mrf.mxu1 }
 0x28f   : > { %2155 = vst [vmem:[%s3300_s21 + $0x160] sm:$0xff] %v2063_v9  ;;  %v2065_v12 = vadd.f32 %v2064_v11, %v1871_v10 }
 0x290   : > { %v1873_v13 = vpop.f32.mrf.mxu0  ;;  %v2066_v14 = vpop.f32.mrf.mxu1 }
 0x291   : > { %2156 = vst [vmem:[%s3300_s21 + $0x168] sm:$0xff] %v2065_v12  ;;  %v2067_v15 = vadd.f32 %v2066_v14, %v1873_v13 }
 0x292   : > { %v1875_v16 = vpop.f32.mrf.mxu0  ;;  %v2068_v17 = vpop.f32.mrf.mxu1 }
 0x293   : > { %2157 = vst [vmem:[%s3300_s21 + $0x170] sm:$0xff] %v2067_v15  ;;  %v2069_v18 = vadd.f32 %v2068_v17, %v1875_v16 }
 0x294   : > { %v1879_v19 = vpop.f32.mrf.mxu0  ;;  %v2072_v20 = vpop.f32.mrf.mxu1 }
 0x295   : > { %2158 = vst [vmem:[%s3300_s21 + $0x178] sm:$0xff] %v2069_v18  ;;  %v2073_v21 = vadd.f32 %v2072_v20, %v1879_v19 }
 0x296   : > { %v1881_v22 = vpop.f32.mrf.mxu0  ;;  %v2074_v23 = vpop.f32.mrf.mxu1 }
 0x297   : > { %2159 = vst [vmem:[%s3300_s21 + $0x180] sm:$0xff] %v2073_v21  ;;  %v2075_v24 = vadd.f32 %v2074_v23, %v1881_v22 }
 0x298   : > { %v1883_v25 = vpop.f32.mrf.mxu0  ;;  %v2076_v26 = vpop.f32.mrf.mxu1 }
 0x299   : > { %2160 = vst [vmem:[%s3300_s21 + $0x188] sm:$0xff] %v2075_v24  ;;  %v2077_v27 = vadd.f32 %v2076_v26, %v1883_v25 }
 0x29a   : > { %v1885_v28 = vpop.f32.mrf.mxu0  ;;  %v2078_v29 = vpop.f32.mrf.mxu1 }
 0x29b   : > { %2161 = vst [vmem:[%s3300_s21 + $0x190] sm:$0xff] %v2077_v27  ;;  %v2079_v30 = vadd.f32 %v2078_v29, %v1885_v28 }
 0x29c   : > { %v1889_v31 = vpop.f32.mrf.mxu0  ;;  %v2082_v32 = vpop.f32.mrf.mxu1 }
 0x29d   : > { %2162 = vst [vmem:[%s3300_s21 + $0x198] sm:$0xff] %v2079_v30  ;;  %v2083_v33 = vadd.f32 %v2082_v32, %v1889_v31 }
 0x29e   : > { %v1891_v34 = vpop.f32.mrf.mxu0  ;;  %v2084_v35 = vpop.f32.mrf.mxu1 }
 0x29f   : > { %2163 = vst [vmem:[%s3300_s21 + $0x1a0] sm:$0xff] %v2083_v33  ;;  %v2085_v36 = vadd.f32 %v2084_v35, %v1891_v34 }
 0x2a0   : > { %v1893_v37 = vpop.f32.mrf.mxu0  ;;  %v2086_v38 = vpop.f32.mrf.mxu1 }
 0x2a1   : > { %2164 = vst [vmem:[%s3300_s21 + $0x1a8] sm:$0xff] %v2085_v36  ;;  %v2087_v39 = vadd.f32 %v2086_v38, %v1893_v37 }
 0x2a2   : > { %v1895_v40 = vpop.f32.mrf.mxu0  ;;  %v2088_v45 = vpop.f32.mrf.mxu1 }
 0x2a3   : > { %2165 = vst [vmem:[%s3300_s21 + $0x1b0] sm:$0xff] %v2087_v39  ;;  %v2089_v46 = vadd.f32 %v2088_v45, %v1895_v40 }
 0x2a4   : > { %v1899_v47 = vpop.f32.mrf.mxu0  ;;  %v2092_v48 = vpop.f32.mrf.mxu1 }
 0x2a5   : > { %2166 = vst [vmem:[%s3300_s21 + $0x1b8] sm:$0xff] %v2089_v46  ;;  %v2093_v49 = vadd.f32 %v2092_v48, %v1899_v47 }
 0x2a6   : > { %v1901_v50 = vpop.f32.mrf.mxu0  ;;  %v2094_v51 = vpop.f32.mrf.mxu1 }
 0x2a7   : > { %2167 = vst [vmem:[%s3300_s21 + $0x1c0] sm:$0xff] %v2093_v49  ;;  %v2095_v52 = vadd.f32 %v2094_v51, %v1901_v50 }
 0x2a8   : > { %v1903_v53 = vpop.f32.mrf.mxu0  ;;  %v2096_v54 = vpop.f32.mrf.mxu1 }
 0x2a9   : > { %2168 = vst [vmem:[%s3300_s21 + $0x1c8] sm:$0xff] %v2095_v52  ;;  %v2097_v55 = vadd.f32 %v2096_v54, %v1903_v53 }
 0x2aa   : > { %v1905_v56 = vpop.f32.mrf.mxu0  ;;  %v2098_v57 = vpop.f32.mrf.mxu1 }
 0x2ab   : > { %2169 = vst [vmem:[%s3300_s21 + $0x1d0] sm:$0xff] %v2097_v55  ;;  %v2099_v58 = vadd.f32 %v2098_v57, %v1905_v56 }
 0x2ac   : > { %v1909_v59 = vpop.f32.mrf.mxu0  ;;  %v2102_v60 = vpop.f32.mrf.mxu1 }
 0x2ad   : > { %2170 = vst [vmem:[%s3300_s21 + $0x1d8] sm:$0xff] %v2099_v58  ;;  %v2103_v61 = vadd.f32 %v2102_v60, %v1909_v59 }
 0x2ae   : > { %v1911_v62 = vpop.f32.mrf.mxu0  ;;  %v2104_v63 = vpop.f32.mrf.mxu1 }
 0x2af   : > { %2171 = vst [vmem:[%s3300_s21 + $0x1e0] sm:$0xff] %v2103_v61  ;;  %v2105_v0 = vadd.f32 %v2104_v63, %v1911_v62 }
 0x2b0   : > { %v1913_v1 = vpop.f32.mrf.mxu0  ;;  %v2106_v2 = vpop.f32.mrf.mxu1 }
 0x2b1   : > { %2172 = vst [vmem:[%s3300_s21 + $0x1e8] sm:$0xff] %v2105_v0  ;;  %v2107_v43 = vadd.f32 %v2106_v2, %v1913_v1 }
 0x2b2   : > { %v1915_v3 = vpop.f32.mrf.mxu0  ;;  %v2108_v44 = vpop.f32.mrf.mxu1 }
 0x2b3   : > { %2173 = vst [vmem:[%s3300_s21 + $0x1f0] sm:$0xff] %v2107_v43  ;;  %v2109_v4 = vadd.f32 %v2108_v44, %v1915_v3 }
 0x2b5   : > { %2174 = vst [vmem:[%s3300_s21 + $0x1f8] sm:$0xff] %v2109_v4 }
 0x2b6   : > { %2840 = shalt.err (!%p2837_p13)
}
 0x2b7   : > { %s2841_s11 = scalar_lea.hbm %s3369_s14, 8192  ;;  %s2845_s29 = scalar_lea.hbm %s3420_s4, 16384 }
 0x2b8   : > { %p2842_p9 = scmp.ne.s32.totalorder %s3369_s14, %s2841_s11  ;;  %p2846_p11 = scmp.lt.s32.totalorder %s3369_s14, %s3420_s4 }
 0x2b9   : > { %p2847_p0 = scmp.lt.s32.totalorder %s2845_s29, %s2841_s11 }
 0x2ba   : > { %p2843_p8 = pnand %p2842_p9, %p3438_p2 }
 0x2bb   : > { %p2848_p3 = por %p2847_p0, %p2846_p11 }
 0x2bc   : > { %p2844_p10 = pneg %p2843_p8 }
 0x2be   : > { %p2849_p1 = pnand %p2848_p3, %p2844_p10 }
 0x2c0   : > { %2852 = shalt.err (!%p2849_p1)
}
 0x2c1   : > { %s2910_s21 = smov 256   ;;  %s2911_s23 = smov 16  }
 0x2c2   : > { %2460 = dma.vmem_to_hbm [thread:$0]  (%p3438_p2), %s3371_s6, 8192, %s3369_s14, %s2176_s19, %s2910_s21, %s2910_s21, %s2911_s23  }
 0x2c3 PF: > { %s2205_s7 = sand.u32 1, %s2887_s15   ;;  %p3439_p4 = scmp.ne.s32.totalorder %s3426_s22, 0 }
 0x2c4   : > { %p3440_p6 = scmp.ge.s32.totalorder %s2899_s18, 2  ;;  %s2206_s12 = scalar_lea.sflag [#allocation4], %s2205_s7 }
 0x2c6   : > { %p2477_p12 = pnand %p3440_p6, %p3439_p4 }
 0x2c8   : > { %p2478_p5 = pneg %p2477_p12 }
 0x2ca   : > { %2882 = dma.done.wait (%p2478_p5), %s2206_s12, 8192  }
 0x2cb   : > { %2884 = vsyncadd (%p2478_p5), %s2206_s12, 4294959104  ;;  %p19_p7 = scmp.ge.s32.totalorder %s3020_s27, 4   ;;  %s3441_s15 = smov %s2891_s16 }
 0x2cc   : > { %s3442_s16 = smov %s2895_s17  ;;  %s3443_s17 = smov %s3030_s5 }
 0x2cd   : > { %s3444_s18 = smov %s3020_s27  ;;  %21 = sbr.rel (!%p19_p7) target bundleno = 7 (0x7), region = 93 }
 0x2d2   :  { %2211 = vsyncpa [#allocation3], 1 }
 0x2d3   :  { %2213 = vsyncpa [#allocation3 + $0x1], 1 }
 0x2d4   :  { %2214 = vsyncpa [#allocation6], 1 }
 0x2d5   :  { %2215 = vsyncpa [#allocation9], 1 }
 0x2d6   :  { %2216 = vsyncpa [#allocation4], 1 }
 0x2d7   :  { %2218 = vsyncpa [#allocation4 + $0x1], 1 }

</bundles_post_ra>
